<compile_context>
chip_gen: v5e
topology: v5e:2x2
jax: 0.10.0
libtpu: 0.0.40
codegen_flags: <defaults>
</compile_context>

<pallas_src>
import jax
import jax.numpy as jnp
from jax.experimental import pallas as pl
from jax.experimental.pallas import tpu as pltpu


# ----------------------------- kernel body ----------------------------------


def _attn_classify_kernel(sim_ref, y_ref, out_ref):
    # sim_ref: [B, T]      (T = S-tile on the 128-lane axis)
    # y_ref:   [B, C, T]
    # out_ref: [C, T]
    B = sim_ref.shape[0]

    sim = sim_ref[...].astype(jnp.float32)                  # [B, T]

    # Numerically-stable softmax over B (sublane axis); each lane (an s position)
    # is independent, so padded lanes of a partial last block cannot pollute
    # valid lanes.
    m = jnp.max(sim, axis=0, keepdims=True)                 # [1, T]
    e = jnp.exp(sim - m)                                    # [B, T]
    denom = jnp.sum(e, axis=0, keepdims=True)               # [1, T]
    # EUP reciprocal (separate VLIW slot) instead of a VALU divide.
    p = e * pl.reciprocal(denom, approx=True)               # [B, T]

    # preds[c, s] = sum_b p[b, s] * y[b, c, s]
    # Unrolled over the tiny static contraction dim B: full-lane 2-D FMAs, no
    # [B, C, T] intermediate, no cross-sublane reduce, no MXU.
    acc = p[0:1, :] * y_ref[0].astype(jnp.float32)          # [C, T]  (b = 0 init)
    for b in range(1, B):
        acc = acc + p[b:b + 1, :] * y_ref[b].astype(jnp.float32)
    out_ref[...] = acc.astype(out_ref.dtype)


# --------------------------- tiling heuristics -------------------------------


def _sublanes(dtype):
    # Sub-32-bit dtypes pack along sublanes: f32 -> 8, bf16 -> 16, 8-bit -> 32.
    itemsize = jnp.dtype(dtype).itemsize
    return max(8, (32 // (8 * itemsize)) * 8)


def _round_up(x, m):
    return ((x + m - 1) // m) * m


def _vmem_cap_bytes():
    """Physical VMEM of the current chip; conservative v7x default if unknown."""
    try:
        cap = int(getattr(pltpu.get_tpu_info(), "vmem_capacity_bytes"))
        if cap > 0:
            return cap
    except Exception:
        pass
    return 64 << 20  # v7x-safe default (v5e/v6e have 128 MiB)


def _working_set_bytes(T, B, C, sim_dtype, y_dtype, out_dtype):
    """Double-buffered VMEM for one grid step, including sublane padding."""
    sim_b = _round_up(B, _sublanes(sim_dtype)) * T * jnp.dtype(sim_dtype).itemsize
    y_b = B * _round_up(C, _sublanes(y_dtype)) * T * jnp.dtype(y_dtype).itemsize
    out_b = _round_up(C, _sublanes(out_dtype)) * T * jnp.dtype(out_dtype).itemsize
    return 2 * (sim_b + y_b + out_b)


def _pick_s_tile(S, B, C, sim_dtype, y_dtype, out_dtype, vmem_cap):
    # ~1/4 of physical VMEM for the working set: ~16 MiB on v7x, ~32 MiB on v5e/v6e.
    budget = max(4 << 20, vmem_cap // 4)
    T = 128
    for cand in (65536, 32768, 16384, 8192, 4096, 2048, 1024, 512, 256, 128):
        if _working_set_bytes(cand, B, C, sim_dtype, y_dtype, out_dtype) <= budget:
            T = cand
            break
    # Keep >= 4 grid steps where possible: 2 TensorCores (v7x megacore) x >= 2
    # pipelined steps each, so DMA overlaps compute on every core.
    while T > 128 and pl.cdiv(S, T) < 4:
        T //= 2
    return T


# ------------------------------- wrappers ------------------------------------


def attentional_classify_bcs(similarities, support_set_y_bcs):
    """Fast path.  similarities: [S, B]; support_set_y_bcs: [B, C, S] (lane-dense
    layout, e.g. produced once by one_hot_support_bcs).  Returns preds [S, C]."""
    S, B = similarities.shape
    B2, C, S2 = support_set_y_bcs.shape
    assert S == S2 and B == B2, "shape mismatch between similarities and support_set_y"

    sim_dtype = similarities.dtype
    y_dtype = support_set_y_bcs.dtype
    out_dtype = sim_dtype

    # sim is tiny relative to y (no C factor); this relayout is cheap.
    simT = jnp.transpose(similarities, (1, 0))               # [B, S]

    vmem_cap = _vmem_cap_bytes()
    T = _pick_s_tile(S, B, C, sim_dtype, y_dtype, out_dtype, vmem_cap)
    grid = (pl.cdiv(S, T),)   # partial last block is masked by Pallas

    working = _working_set_bytes(T, B, C, sim_dtype, y_dtype, out_dtype)
    vmem_limit = int(min(vmem_cap, max(32 << 20, 2 * working)))

    sim_bytes = jnp.dtype(sim_dtype).itemsize
    y_bytes = jnp.dtype(y_dtype).itemsize
    out_bytes = jnp.dtype(out_dtype).itemsize
    cost = pl.CostEstimate(
        flops=2 * S * B * C + 4 * S * B,
        transcendentals=S * B + S,
        bytes_accessed=S * B * sim_bytes + S * B * C * y_bytes + S * C * out_bytes,
    )

    outT = pl.pallas_call(
        _attn_classify_kernel,
        out_shape=jax.ShapeDtypeStruct((C, S), out_dtype),
        grid=grid,
        in_specs=[
            pl.BlockSpec((B, T), lambda i: (0, i)),
            pl.BlockSpec((B, C, T), lambda i: (0, 0, i)),
        ],
        out_specs=pl.BlockSpec((C, T), lambda i: (0, i)),
        compiler_params=pltpu.CompilerParams(
            # S-tiles are independent: shards across the 2 TCs on v7x,
            # harmless no-op on v5e/v6e.
            dimension_semantics=("parallel",),
            vmem_limit_bytes=vmem_limit,
        ),
        cost_estimate=cost,
    )(simT, support_set_y_bcs)

    # Back to the PyTorch-facing layout.  No .squeeze() — always [S, C].
    return jnp.transpose(outT, (1, 0))


_TINY_BYTES = 256 * 1024


def _xla_attentional_classify(similarities, support_set_y):
    p = jax.nn.softmax(similarities.astype(jnp.float32), axis=1)          # [S, B]
    preds = jnp.einsum("sb,sbc->sc", p, support_set_y.astype(jnp.float32))
    return preds.astype(similarities.dtype)


def attentional_classify(similarities, support_set_y):
    """PyTorch-contract entry point.
    similarities: [S, B]; support_set_y: [S, B, C] -> preds [S, C]."""
    S, B = similarities.shape
    S2, B2, C = support_set_y.shape
    assert S == S2 and B == B2, "shape mismatch between similarities and support_set_y"

    if S * B * C * jnp.dtype(support_set_y.dtype).itemsize < _TINY_BYTES:
        # Module-default sized problems: pallas_call fixed overhead + relayouts
        # would dwarf the work; let XLA fuse it.
        return _xla_attentional_classify(similarities, support_set_y)

    # One-time relayout of the big array to the lane-dense [B, C, S] layout.
    # NOTE: in Matching Networks the support set is reused across many query
    # batches — cache this transpose (or build the one-hot directly via
    # one_hot_support_bcs) and call attentional_classify_bcs to avoid paying
    # this HBM relayout on every call.
    y_bcs = jnp.transpose(support_set_y, (1, 2, 0))
    return attentional_classify_bcs(similarities, y_bcs)


def one_hot_support_bcs(labels_sb, num_classes, dtype=jnp.bfloat16):
    """Build one-hot support targets directly in the kernel's [B, C, S] layout
    (no relayout of a pre-existing [S, B, C] array).  labels_sb: [S, B] ints."""
    return jax.nn.one_hot(labels_sb.T, num_classes, axis=1, dtype=dtype)


# ------------------------------- self-test ------------------------------------


if __name__ == "__main__":
    key = jax.random.PRNGKey(0)
    k1, k2, k3, k4, k5, k6 = jax.random.split(key, 6)
    B, C = 4, 5

    # 1) Module-default tiny shapes (S=8, B=4, C=5): dispatcher takes the XLA path.
    S = 8
    sim = jax.random.normal(k1, (S, B), dtype=jnp.float32)
    labels = jax.random.randint(k2, (S, B), 0, C)
    y_sbc = jax.nn.one_hot(labels, C, dtype=jnp.float32)                  # [S, B, C]
    preds = jax.block_until_ready(attentional_classify(sim, y_sbc))
    ref = _xla_attentional_classify(sim, y_sbc)
    assert preds.shape == (S, C), f"bad shape {preds.shape}"
    assert jnp.allclose(preds, ref, atol=2e-3, rtol=2e-3), "tiny-path mismatch"

    # 2) Pallas fast path: one-hot built directly in [B, C, S], bf16 targets
    #    (half the HBM traffic), no per-call relayout of the big array.
    S = 16384
    sim = jax.random.normal(k3, (S, B), dtype=jnp.float32)
    labels = jax.random.randint(k4, (S, B), 0, C)
    y_bcs = one_hot_support_bcs(labels, C, dtype=jnp.bfloat16)            # [B, C, S]
    preds = jax.block_until_ready(attentional_classify_bcs(sim, y_bcs))
    y_sbc_ref = jnp.transpose(y_bcs, (2, 0, 1)).astype(jnp.float32)       # [S, B, C]
    ref = _xla_attentional_classify(sim, y_sbc_ref)
    assert preds.shape == (S, C), f"bad shape {preds.shape}"
    assert jnp.allclose(preds, ref, atol=2e-3, rtol=2e-3), "bcs fast-path mismatch"

    # 3) Pallas path via the PyTorch-contract wrapper with a non-128-multiple S
    #    (exercises the cdiv grid + masked partial last block).
    S = 10000
    sim = jax.random.normal(k5, (S, B), dtype=jnp.float32)
    labels = jax.random.randint(k6, (S, B), 0, C)
    y_sbc = jax.nn.one_hot(labels, C, dtype=jnp.float32)                  # [S, B, C]
    preds = jax.block_until_ready(attentional_classify(sim, y_sbc))
    ref = _xla_attentional_classify(sim, y_sbc)
    assert preds.shape == (S, C), f"bad shape {preds.shape}"
    assert jnp.allclose(preds, ref, atol=2e-3, rtol=2e-3), "padded-path mismatch"

    print("KERNEL_OK")
</pallas_src>

<mosaic_0001>
module attributes {stable_mosaic.version = 11 : i64} {
  func.func @_attn_classify_kernel(%arg0: i32, %arg1: memref<4x4096xf32, #tpu.memory_space<vmem>>, %arg2: memref<4x5x4096xbf16, #tpu.memory_space<vmem>>, %arg3: memref<5x4096xf32, #tpu.memory_space<vmem>>) attributes {dimension_semantics = [#tpu.dimension_semantics<parallel>], iteration_bounds = array<i64: 4>, scalar_prefetch = 0 : i64, scratch_operands = 0 : i64, tpu.core_type = #tpu.core_type<tc>, window_params = [{transform_indices = @transform_0, window_bounds = array<i64: 4, 4096>}, {transform_indices = @transform_1, window_bounds = array<i64: 4, 5, 4096>}, {transform_indices = @transform_2, window_bounds = array<i64: 5, 4096>}]} {
    %c0 = arith.constant 0 : index
    %c0_0 = arith.constant 0 : index
    %0 = vector.load %arg1[%c0, %c0_0] : memref<4x4096xf32, #tpu.memory_space<vmem>>, vector<4x4096xf32>
    %cst = arith.constant dense<0xFF800000> : vector<4096xf32>
    %1 = vector.multi_reduction <maximumf>, %0, %cst [0] : vector<4x4096xf32> to vector<4096xf32>
    %2 = vector.shape_cast %1 : vector<4096xf32> to vector<1x4096xf32>
    %3 = vector.broadcast %2 : vector<1x4096xf32> to vector<4x4096xf32>
    %4 = arith.subf %0, %3 : vector<4x4096xf32>
    %5 = math.exp %4 : vector<4x4096xf32>
    %cst_1 = arith.constant dense<0.000000e+00> : vector<4096xf32>
    %6 = vector.multi_reduction <add>, %5, %cst_1 [0] : vector<4x4096xf32> to vector<4096xf32>
    %7 = vector.shape_cast %6 : vector<4096xf32> to vector<1x4096xf32>
    %8 = tpu.reciprocal %7 {approx = true} : vector<1x4096xf32> -> vector<1x4096xf32>
    %9 = vector.broadcast %8 : vector<1x4096xf32> to vector<4x4096xf32>
    %10 = arith.mulf %5, %9 : vector<4x4096xf32>
    %11 = vector.extract_strided_slice %10 {offsets = [0, 0], sizes = [1, 4096], strides = [1, 1]} : vector<4x4096xf32> to vector<1x4096xf32>
    %c0_2 = arith.constant 0 : index
    %c0_3 = arith.constant 0 : index
    %c0_4 = arith.constant 0 : index
    %12 = vector.load %arg2[%c0_2, %c0_3, %c0_4] : memref<4x5x4096xbf16, #tpu.memory_space<vmem>>, vector<1x5x4096xbf16>
    %13 = vector.shape_cast %12 : vector<1x5x4096xbf16> to vector<5x4096xbf16>
    %14 = arith.extf %13 : vector<5x4096xbf16> to vector<5x4096xf32>
    %15 = vector.broadcast %11 : vector<1x4096xf32> to vector<5x4096xf32>
    %16 = arith.mulf %15, %14 : vector<5x4096xf32>
    %17 = vector.extract_strided_slice %10 {offsets = [1, 0], sizes = [1, 4096], strides = [1, 1]} : vector<4x4096xf32> to vector<1x4096xf32>
    %c1 = arith.constant 1 : index
    %c0_5 = arith.constant 0 : index
    %c0_6 = arith.constant 0 : index
    %18 = vector.load %arg2[%c1, %c0_5, %c0_6] : memref<4x5x4096xbf16, #tpu.memory_space<vmem>>, vector<1x5x4096xbf16>
    %19 = vector.shape_cast %18 : vector<1x5x4096xbf16> to vector<5x4096xbf16>
    %20 = arith.extf %19 : vector<5x4096xbf16> to vector<5x4096xf32>
    %21 = vector.broadcast %17 : vector<1x4096xf32> to vector<5x4096xf32>
    %22 = arith.mulf %21, %20 : vector<5x4096xf32>
    %23 = arith.addf %16, %22 : vector<5x4096xf32>
    %24 = vector.extract_strided_slice %10 {offsets = [2, 0], sizes = [1, 4096], strides = [1, 1]} : vector<4x4096xf32> to vector<1x4096xf32>
    %c2 = arith.constant 2 : index
    %c0_7 = arith.constant 0 : index
    %c0_8 = arith.constant 0 : index
    %25 = vector.load %arg2[%c2, %c0_7, %c0_8] : memref<4x5x4096xbf16, #tpu.memory_space<vmem>>, vector<1x5x4096xbf16>
    %26 = vector.shape_cast %25 : vector<1x5x4096xbf16> to vector<5x4096xbf16>
    %27 = arith.extf %26 : vector<5x4096xbf16> to vector<5x4096xf32>
    %28 = vector.broadcast %24 : vector<1x4096xf32> to vector<5x4096xf32>
    %29 = arith.mulf %28, %27 : vector<5x4096xf32>
    %30 = arith.addf %23, %29 : vector<5x4096xf32>
    %31 = vector.extract_strided_slice %10 {offsets = [3, 0], sizes = [1, 4096], strides = [1, 1]} : vector<4x4096xf32> to vector<1x4096xf32>
    %c3 = arith.constant 3 : index
    %c0_9 = arith.constant 0 : index
    %c0_10 = arith.constant 0 : index
    %32 = vector.load %arg2[%c3, %c0_9, %c0_10] : memref<4x5x4096xbf16, #tpu.memory_space<vmem>>, vector<1x5x4096xbf16>
    %33 = vector.shape_cast %32 : vector<1x5x4096xbf16> to vector<5x4096xbf16>
    %34 = arith.extf %33 : vector<5x4096xbf16> to vector<5x4096xf32>
    %35 = vector.broadcast %31 : vector<1x4096xf32> to vector<5x4096xf32>
    %36 = arith.mulf %35, %34 : vector<5x4096xf32>
    %37 = arith.addf %30, %36 : vector<5x4096xf32>
    %c0_11 = arith.constant 0 : index
    %c0_12 = arith.constant 0 : index
    %38 = vector.load %arg3[%c0_11, %c0_12] : memref<5x4096xf32, #tpu.memory_space<vmem>>, vector<5x4096xf32>
    tpu.vector_store %arg3[%c0_11, %c0_12], %37 {strides = array<i32>} : memref<5x4096xf32, #tpu.memory_space<vmem>>, vector<5x4096xf32>,
    return
  }
  func.func @transform_0(%arg0: i32) -> (i32, i32) {
    %c0_i32 = arith.constant 0 : i32
    %c0_i32_0 = arith.constant 0 : i32
    return %c0_i32, %arg0 : i32, i32
  }
  func.func @transform_1(%arg0: i32) -> (i32, i32, i32) {
    %c0_i32 = arith.constant 0 : i32
    %c0_i32_0 = arith.constant 0 : i32
    %c0_i32_1 = arith.constant 0 : i32
    return %c0_i32, %c0_i32_0, %arg0 : i32, i32, i32
  }
  func.func @transform_2(%arg0: i32) -> (i32, i32) {
    %c0_i32 = arith.constant 0 : i32
    %c0_i32_0 = arith.constant 0 : i32
    return %c0_i32, %arg0 : i32, i32
  }
}

</mosaic_0001>

<bundles_post_ra>
// kernel: tpu_custom_call.1
= control target key start
LH: loop header
LB: loop body
LE: loop exit
PB: predicated region body
PF: predicated region fallthrough
CT: control target
= control target key end

     0   :  { %7 = vsyncpa [#allocation4], 0  ;;  %s3375_s0 = inlined_call_operand.vmem [shape: f32[4,16384], index: 0, kind: input, shape index: {}]   ;;  %s3376_s1 = inlined_call_operand.vmem [shape: bf16[4,5,16384], index: 1, kind: input, shape index: {}]   ;;  %s3377_s2 = inlined_call_operand.hbm [shape: f32[5,16384], index: 2, kind: output, shape index: {}]  }
   0x1   :  { %9 = vsyncpa [#allocation4 + $0x1], 0  ;;  %s2456_s9 = smov 0   ;;  %s2458_s10 = smov 0  }
   0x2   :  { %s2460_s11 = smov 0   ;;  %s2462_s12 = smov 0  }
   0x3 LB: > { %s2477_s13 = sadd.s32 4294967295, %s2439_s12   ;;  %s2176_s14 = sadd.s32 4294967294, %s2439_s12   ;;  %s2439_s12 = sphi %s2462_s12, %s3428_s12   ;;  %s2435_s11 = sphi %s2460_s11, %s3427_s11   ;;  %s2431_s10 = sphi %s2458_s10, %s3426_s10   ;;  %s2427_s9 = sphi %s2456_s9, %s3425_s9  }
   0x4   : > { %s2481_s15 = sadd.s32 1, %s2439_s12   ;;  %s48_s16 = sadd.s32 1, %s2435_s11 }
   0x5   : > { %s45_s17 = ssub.s32 %s2439_s12, %s2481_s15  ;;  %p55_p0 = scmp.ne.s32.totalorder %s2435_s11, %s2431_s10 }
   0x6   : > { %p46_p1 = scmp.eq.s32.totalorder %s45_s17, 0  ;;  %p56_p2 = scmp.eq.s32.totalorder %s2439_s12, 0 }
   0x7   : > { %p85_p3 = scmp.eq.s32.totalorder %s2477_s13, 3  ;;  %p90_p4 = scmp.ne.s32.totalorder %s2431_s10, %s2427_s9 }
   0x8   : > { %s2493_s18 = scalar_select %p46_p1, %s2435_s11, %s48_s16  }
   0x9   : > { %p57_p5 = por %p56_p2, %p55_p0  ;;  %p2495_p6 = por %p85_p3, %p55_p0 }
   0xa   : > { %p91_p7 = scmp.eq.s32.totalorder %s2176_s14, 3  ;;  %p2178_p9 = scmp.ge.s32.totalorder %s2439_s12, 4 }
   0xc   : > { %p2499_p8 = por %p91_p7, %p90_p4  ;;  %107 = sbr.rel (%p2178_p9) target bundleno = 85 (0x55), region = 16 }
  0x11   : > { %119 = sbr.rel (!%p57_p5) target bundleno = 85 (0x55), region = 24  ;;  %s121_s21 = sand.u32 (%p57_p5), 1, %s2435_s11  }
  0x12   : > { %s2240_s22 = sshll.u32 (%p57_p5), %s2439_s12, 7  ;;  %s2179_s23 = sshll.u32 (%p57_p5), %s121_s21, 9 }
  0x13   : > { %s2509_s26 = scalar_lea.vmem (%p57_p5), %s3376_s1, %s2240_s22  ;;  %s2514_s27 = scalar_lea.vmem (%p57_p5), [#allocation2], %s2179_s23 }
  0x14   : > { %v139_v0 = vld [vmem:[%s2509_s26] sm:$0xff] (%p57_p5)  ;;  %v141_v1 = vld [vmem:[%s2509_s26 + $0x8] sm:$0xff] (%p57_p5)  ;;  %v143_v2 = vld [vmem:[%s2509_s26 + $0x10] sm:$0xff] (%p57_p5) }
  0x15   : > { %140 = vst [vmem:[%s2514_s27] sm:$0xff] (%p57_p5), %v139_v0  ;;  %v145_v3 = vld [vmem:[%s2509_s26 + $0x18] sm:$0xff] (%p57_p5)  ;;  %v147_v4 = vld [vmem:[%s2509_s26 + $0x20] sm:$0xff] (%p57_p5)  ;;  %v149_v5 = vld [vmem:[%s2509_s26 + $0x28] sm:$0xff] (%p57_p5) }
  0x16   : > { %142 = vst [vmem:[%s2514_s27 + $0x8] sm:$0xff] %v141_v1  ;;  %v151_v6 = vld [vmem:[%s2509_s26 + $0x30] sm:$0xff]  ;;  %v153_v7 = vld [vmem:[%s2509_s26 + $0x38] sm:$0xff]  ;;  %v155_v8 = vld [vmem:[%s2509_s26 + $0x40] sm:$0xff] }
  0x17   : > { %144 = vst [vmem:[%s2514_s27 + $0x10] sm:$0xff] %v143_v2  ;;  %v157_v9 = vld [vmem:[%s2509_s26 + $0x48] sm:$0xff]  ;;  %v159_v10 = vld [vmem:[%s2509_s26 + $0x50] sm:$0xff]  ;;  %v161_v11 = vld [vmem:[%s2509_s26 + $0x58] sm:$0xff] }
  0x18   : > { %146 = vst [vmem:[%s2514_s27 + $0x18] sm:$0xff] %v145_v3  ;;  %v163_v12 = vld [vmem:[%s2509_s26 + $0x60] sm:$0xff]  ;;  %v165_v13 = vld [vmem:[%s2509_s26 + $0x68] sm:$0xff]  ;;  %v167_v14 = vld [vmem:[%s2509_s26 + $0x70] sm:$0xff] }
  0x19   : > { %148 = vst [vmem:[%s2514_s27 + $0x20] sm:$0xff] %v147_v4  ;;  %v169_v15 = vld [vmem:[%s2509_s26 + $0x78] sm:$0xff]  ;;  %v171_v16 = vld [vmem:[%s2509_s26 + $0x200] sm:$0xff]  ;;  %v173_v17 = vld [vmem:[%s2509_s26 + $0x208] sm:$0xff] }
  0x1a   : > { %150 = vst [vmem:[%s2514_s27 + $0x28] sm:$0xff] %v149_v5  ;;  %v175_v18 = vld [vmem:[%s2509_s26 + $0x210] sm:$0xff]  ;;  %v177_v19 = vld [vmem:[%s2509_s26 + $0x218] sm:$0xff]  ;;  %v179_v20 = vld [vmem:[%s2509_s26 + $0x220] sm:$0xff] }
  0x1b   : > { %152 = vst [vmem:[%s2514_s27 + $0x30] sm:$0xff] %v151_v6  ;;  %v181_v21 = vld [vmem:[%s2509_s26 + $0x228] sm:$0xff]  ;;  %v183_v22 = vld [vmem:[%s2509_s26 + $0x230] sm:$0xff]  ;;  %v185_v23 = vld [vmem:[%s2509_s26 + $0x238] sm:$0xff] }
  0x1c   : > { %154 = vst [vmem:[%s2514_s27 + $0x38] sm:$0xff] %v153_v7  ;;  %v187_v24 = vld [vmem:[%s2509_s26 + $0x240] sm:$0xff]  ;;  %v189_v25 = vld [vmem:[%s2509_s26 + $0x248] sm:$0xff]  ;;  %v191_v26 = vld [vmem:[%s2509_s26 + $0x250] sm:$0xff] }
  0x1d   : > { %156 = vst [vmem:[%s2514_s27 + $0x40] sm:$0xff] %v155_v8  ;;  %v193_v27 = vld [vmem:[%s2509_s26 + $0x258] sm:$0xff]  ;;  %v195_v28 = vld [vmem:[%s2509_s26 + $0x260] sm:$0xff]  ;;  %v197_v29 = vld [vmem:[%s2509_s26 + $0x268] sm:$0xff] }
  0x1e   : > { %158 = vst [vmem:[%s2514_s27 + $0x48] sm:$0xff] %v157_v9  ;;  %v199_v30 = vld [vmem:[%s2509_s26 + $0x270] sm:$0xff]  ;;  %v201_v31 = vld [vmem:[%s2509_s26 + $0x278] sm:$0xff]  ;;  %v203_v32 = vld [vmem:[%s2509_s26 + $0x400] sm:$0xff] }
  0x1f   : > { %160 = vst [vmem:[%s2514_s27 + $0x50] sm:$0xff] %v159_v10  ;;  %v205_v33 = vld [vmem:[%s2509_s26 + $0x408] sm:$0xff]  ;;  %v207_v34 = vld [vmem:[%s2509_s26 + $0x410] sm:$0xff]  ;;  %v209_v35 = vld [vmem:[%s2509_s26 + $0x418] sm:$0xff] }
  0x20   : > { %162 = vst [vmem:[%s2514_s27 + $0x58] sm:$0xff] %v161_v11  ;;  %v211_v36 = vld [vmem:[%s2509_s26 + $0x420] sm:$0xff]  ;;  %v213_v37 = vld [vmem:[%s2509_s26 + $0x428] sm:$0xff]  ;;  %v215_v38 = vld [vmem:[%s2509_s26 + $0x430] sm:$0xff] }
  0x21   : > { %164 = vst [vmem:[%s2514_s27 + $0x60] sm:$0xff] %v163_v12  ;;  %v217_v39 = vld [vmem:[%s2509_s26 + $0x438] sm:$0xff]  ;;  %v219_v40 = vld [vmem:[%s2509_s26 + $0x440] sm:$0xff]  ;;  %v221_v41 = vld [vmem:[%s2509_s26 + $0x448] sm:$0xff] }
  0x22   : > { %166 = vst [vmem:[%s2514_s27 + $0x68] sm:$0xff] %v165_v13  ;;  %v223_v42 = vld [vmem:[%s2509_s26 + $0x450] sm:$0xff]  ;;  %v225_v43 = vld [vmem:[%s2509_s26 + $0x458] sm:$0xff]  ;;  %v227_v44 = vld [vmem:[%s2509_s26 + $0x460] sm:$0xff] }
  0x23   : > { %168 = vst [vmem:[%s2514_s27 + $0x70] sm:$0xff] %v167_v14  ;;  %v229_v45 = vld [vmem:[%s2509_s26 + $0x468] sm:$0xff]  ;;  %v231_v46 = vld [vmem:[%s2509_s26 + $0x470] sm:$0xff]  ;;  %v233_v47 = vld [vmem:[%s2509_s26 + $0x478] sm:$0xff] }
  0x24   : > { %170 = vst [vmem:[%s2514_s27 + $0x78] sm:$0xff] %v169_v15  ;;  %v235_v48 = vld [vmem:[%s2509_s26 + $0x600] sm:$0xff]  ;;  %v237_v49 = vld [vmem:[%s2509_s26 + $0x608] sm:$0xff]  ;;  %v239_v50 = vld [vmem:[%s2509_s26 + $0x610] sm:$0xff] }
  0x25   : > { %172 = vst [vmem:[%s2514_s27 + $0x80] sm:$0xff] %v171_v16  ;;  %v241_v51 = vld [vmem:[%s2509_s26 + $0x618] sm:$0xff]  ;;  %v243_v52 = vld [vmem:[%s2509_s26 + $0x620] sm:$0xff]  ;;  %v245_v53 = vld [vmem:[%s2509_s26 + $0x628] sm:$0xff] }
  0x26   : > { %174 = vst [vmem:[%s2514_s27 + $0x88] sm:$0xff] %v173_v17  ;;  %v247_v54 = vld [vmem:[%s2509_s26 + $0x630] sm:$0xff]  ;;  %v249_v55 = vld [vmem:[%s2509_s26 + $0x638] sm:$0xff]  ;;  %v251_v56 = vld [vmem:[%s2509_s26 + $0x640] sm:$0xff] }
  0x27   : > { %176 = vst [vmem:[%s2514_s27 + $0x90] sm:$0xff] %v175_v18  ;;  %v253_v57 = vld [vmem:[%s2509_s26 + $0x648] sm:$0xff]  ;;  %v255_v58 = vld [vmem:[%s2509_s26 + $0x650] sm:$0xff]  ;;  %v257_v59 = vld [vmem:[%s2509_s26 + $0x658] sm:$0xff] }
  0x28   : > { %178 = vst [vmem:[%s2514_s27 + $0x98] sm:$0xff] %v177_v19  ;;  %v259_v60 = vld [vmem:[%s2509_s26 + $0x660] sm:$0xff]  ;;  %v261_v61 = vld [vmem:[%s2509_s26 + $0x668] sm:$0xff]  ;;  %v263_v62 = vld [vmem:[%s2509_s26 + $0x670] sm:$0xff] }
  0x29   : > { %180 = vst [vmem:[%s2514_s27 + $0xa0] sm:$0xff] %v179_v20  ;;  %v265_v63 = vld [vmem:[%s2509_s26 + $0x678] sm:$0xff] }
  0x2a   : > { %182 = vst [vmem:[%s2514_s27 + $0xa8] sm:$0xff] %v181_v21 }
  0x2b   : > { %184 = vst [vmem:[%s2514_s27 + $0xb0] sm:$0xff] %v183_v22 }
  0x2c   : > { %186 = vst [vmem:[%s2514_s27 + $0xb8] sm:$0xff] %v185_v23 }
  0x2d   : > { %188 = vst [vmem:[%s2514_s27 + $0xc0] sm:$0xff] %v187_v24 }
  0x2e   : > { %190 = vst [vmem:[%s2514_s27 + $0xc8] sm:$0xff] %v189_v25 }
  0x2f   : > { %192 = vst [vmem:[%s2514_s27 + $0xd0] sm:$0xff] %v191_v26 }
  0x30   : > { %194 = vst [vmem:[%s2514_s27 + $0xd8] sm:$0xff] %v193_v27 }
  0x31   : > { %196 = vst [vmem:[%s2514_s27 + $0xe0] sm:$0xff] %v195_v28 }
  0x32   : > { %198 = vst [vmem:[%s2514_s27 + $0xe8] sm:$0xff] %v197_v29 }
  0x33   : > { %200 = vst [vmem:[%s2514_s27 + $0xf0] sm:$0xff] %v199_v30 }
  0x34   : > { %202 = vst [vmem:[%s2514_s27 + $0xf8] sm:$0xff] %v201_v31 }
  0x35   : > { %204 = vst [vmem:[%s2514_s27 + $0x100] sm:$0xff] %v203_v32 }
  0x36   : > { %206 = vst [vmem:[%s2514_s27 + $0x108] sm:$0xff] %v205_v33 }
  0x37   : > { %208 = vst [vmem:[%s2514_s27 + $0x110] sm:$0xff] %v207_v34 }
  0x38   : > { %210 = vst [vmem:[%s2514_s27 + $0x118] sm:$0xff] %v209_v35 }
  0x39   : > { %212 = vst [vmem:[%s2514_s27 + $0x120] sm:$0xff] %v211_v36 }
  0x3a   : > { %214 = vst [vmem:[%s2514_s27 + $0x128] sm:$0xff] %v213_v37 }
  0x3b   : > { %216 = vst [vmem:[%s2514_s27 + $0x130] sm:$0xff] %v215_v38 }
  0x3c   : > { %218 = vst [vmem:[%s2514_s27 + $0x138] sm:$0xff] %v217_v39 }
  0x3d   : > { %220 = vst [vmem:[%s2514_s27 + $0x140] sm:$0xff] %v219_v40 }
  0x3e   : > { %222 = vst [vmem:[%s2514_s27 + $0x148] sm:$0xff] %v221_v41 }
  0x3f   : > { %224 = vst [vmem:[%s2514_s27 + $0x150] sm:$0xff] %v223_v42 }
  0x40   : > { %226 = vst [vmem:[%s2514_s27 + $0x158] sm:$0xff] %v225_v43 }
  0x41   : > { %228 = vst [vmem:[%s2514_s27 + $0x160] sm:$0xff] %v227_v44 }
  0x42   : > { %230 = vst [vmem:[%s2514_s27 + $0x168] sm:$0xff] %v229_v45 }
  0x43   : > { %232 = vst [vmem:[%s2514_s27 + $0x170] sm:$0xff] %v231_v46 }
  0x44   : > { %234 = vst [vmem:[%s2514_s27 + $0x178] sm:$0xff] %v233_v47 }
  0x45   : > { %236 = vst [vmem:[%s2514_s27 + $0x180] sm:$0xff] %v235_v48 }
  0x46   : > { %238 = vst [vmem:[%s2514_s27 + $0x188] sm:$0xff] %v237_v49 }
  0x47   : > { %240 = vst [vmem:[%s2514_s27 + $0x190] sm:$0xff] %v239_v50 }
  0x48   : > { %242 = vst [vmem:[%s2514_s27 + $0x198] sm:$0xff] %v241_v51 }
  0x49   : > { %244 = vst [vmem:[%s2514_s27 + $0x1a0] sm:$0xff] %v243_v52 }
  0x4a   : > { %246 = vst [vmem:[%s2514_s27 + $0x1a8] sm:$0xff] %v245_v53 }
  0x4b   : > { %248 = vst [vmem:[%s2514_s27 + $0x1b0] sm:$0xff] %v247_v54 }
  0x4c   : > { %250 = vst [vmem:[%s2514_s27 + $0x1b8] sm:$0xff] %v249_v55 }
  0x4d   : > { %252 = vst [vmem:[%s2514_s27 + $0x1c0] sm:$0xff] %v251_v56 }
  0x4e   : > { %254 = vst [vmem:[%s2514_s27 + $0x1c8] sm:$0xff] %v253_v57 }
  0x4f   : > { %256 = vst [vmem:[%s2514_s27 + $0x1d0] sm:$0xff] %v255_v58 }
  0x50   : > { %258 = vst [vmem:[%s2514_s27 + $0x1d8] sm:$0xff] %v257_v59 }
  0x51   : > { %260 = vst [vmem:[%s2514_s27 + $0x1e0] sm:$0xff] %v259_v60 }
  0x52   : > { %262 = vst [vmem:[%s2514_s27 + $0x1e8] sm:$0xff] %v261_v61 }
  0x53   : > { %264 = vst [vmem:[%s2514_s27 + $0x1f0] sm:$0xff] %v263_v62 }
  0x54   : > { %266 = vst [vmem:[%s2514_s27 + $0x1f8] sm:$0xff] %v265_v63 }
  0x55 PF: > { %p2182_p10 = scmp.ge.s32.totalorder %s2439_s12, 1  ;;  %p271_p11 = scmp.lt.s32.totalorder %s2439_s12, 5 }
  0x57   : > { %p272_p12 = pnand %p2182_p10, %p271_p11 }
  0x59   : > { %275 = sbr.rel (%p272_p12) target bundleno = 424 (0x1a8), region = 47 }
  0x5e   : > { %s2185_s28 = sshll.u32 %s2477_s13, 5  ;;  %vm427_vm0 = vcmask 1043456   ;;  %s2996_s5 = sand.u32 1, %s2431_s10  }
  0x5f   : > { %p305_p13 = scmp.lt.s32.totalorder %s2185_s28, 127  ;;  %s2183_s6 = sshll.u32 %s2996_s5, 9 }
  0x60   : > { %s3020_s7 = scalar_lea.vmem [#allocation2], %s2183_s6  ;;  %s2184_s8 = sshll.u32 %s2996_s5, 8 }
  0x61   : > { %s3430_s28 = smov (!%p305_p13, %s2185_s28), 127  ;;  %s3082_s14 = scalar_lea.vmem [#allocation3], %s2184_s8 }
  0x62   : > { %s2186_s29 = sshll.u32 %s3430_s28, 2  ;;  %s2241_s16 = sshll.u32 %s2477_s13, 8 }
  0x63   : > { %s2647_s4 = scalar_lea.vmem %s3375_s0, %s2186_s29  ;;  %s2094_s22 = scalar_lea.hbm %s3377_s2, %s2241_s16 }
  0x64   : > { %v2650_v0 = vld [vmem:[%s2647_s4] sm:$0xff]  ;;  %v2653_v1 = vld [vmem:[%s2647_s4 + $0x8] sm:$0xff]  ;;  %v2656_v2 = vld [vmem:[%s2647_s4 + $0x10] sm:$0xff]  ;;  %s2096_s13 = sshll.u32 %s3082_s14, 4  ;;  %s2098_s23 = sshll.u32 %s2094_s22, 4  ;;  %s2097_s13 = int_to_ptr.vmem [resolvable:$true] %s2096_s13  ;;  %s2099_s23 = int_to_ptr.hbm [resolvable:$true] %s2098_s23 }
  0x65   : > { %344 = vst [vmem:[#allocation1] ss:$2 sm:$0xff] %v2650_v0  ;;  %v2660_v3 = vld [vmem:[%s2647_s4 + $0x18] sm:$0xff]  ;;  %v2670_v16 = vld [vmem:[%s2647_s4 + $0x20] sm:$0xff]  ;;  %v2674_v22 = vld [vmem:[%s2647_s4 + $0x28] sm:$0xff]  ;;  %s2083_s24 = scalar_lea.sflag [#allocation4], %s2996_s5 }
  0x66   : > { %346 = vst [vmem:[#allocation1 + $0x10] ss:$2 sm:$0xff] %v2653_v1  ;;  %v2678_v27 = vld [vmem:[%s2647_s4 + $0x30] sm:$0xff]  ;;  %v2684_v37 = vld [vmem:[%s2647_s4 + $0x38] sm:$0xff]  ;;  %s2391_s25 = sshra.s32 %s2099_s23, 4  ;;  %s2397_s29 = scalar_lea.hbm %s3377_s2, 1024  ;;  %s2392_s25 = int_to_ptr.hbm [resolvable:$true] %s2391_s25 }
  0x67   : > { %348 = vst [vmem:[#allocation1 + $0x20] ss:$2 sm:$0xff] %v2656_v2  ;;  %s2393_s26 = scalar_lea.hbm %s2392_s25, 256  ;;  %p2398_p3 = scmp.lt.s32.totalorder %s2392_s25, %s3377_s2 }
  0x68   : > { %350 = vst [vmem:[#allocation1 + $0x30] ss:$2 sm:$0xff] %v2660_v3  ;;  %p2394_p0 = scmp.ne.s32.totalorder %s2392_s25, %s2393_s26  ;;  %p2399_p4 = scmp.lt.s32.totalorder %s2397_s29, %s2393_s26 }
  0x6a   : > { %p2395_p1 = pnand %p2394_p0, %p2495_p6  ;;  %p2400_p5 = por %p2399_p4, %p2398_p3 }
  0x6c   : > { %v351_v4 = vld.sshfl [vmem:[#allocation1] sm:$0xff pattern:$0x75316420]  ;;  %v352_v5 = vld.sshfl [vmem:[#allocation1 + $0x8] sm:$0xff pattern:$0x75316420]  ;;  %p2396_p2 = pneg %p2395_p1 }
  0x6d   : > { %v428_v6 = vsel %vm427_vm0, %v351_v4, -inf  ;;  %v435_v7 = vsel %vm427_vm0, %v352_v5, -inf  ;;  %v353_v8 = vld.sshfl [vmem:[#allocation1 + $0x10] sm:$0xff pattern:$0x75316420] }
  0x6e   : > { %v429_v9 = vrot.slane %v428_v6, 4  ;;  %v436_v10 = vrot.slane %v435_v7, 4  ;;  %v354_v11 = vld.sshfl [vmem:[#allocation1 + $0x18] sm:$0xff pattern:$0x75316420]  ;;  %v442_v12 = vsel %vm427_vm0, %v353_v8, -inf  ;;  %p2401_p7 = pnand %p2400_p5, %p2396_p2 }
  0x6f   : > { %v443_v13 = vrot.slane %v442_v12, 4  ;;  %v449_v14 = vsel %vm427_vm0, %v354_v11, -inf  ;;  %v355_v15 = vld.sshfl [vmem:[#allocation1 + $0x20] sm:$0xff pattern:$0x75316420] }
  0x70   : > { %v430_v17 = vmax.f32 %v428_v6, %v429_v9  ;;  %v437_v18 = vmax.f32 %v435_v7, %v436_v10  ;;  %v450_v19 = vrot.slane %v449_v14, 4  ;;  %v356_v20 = vld.sshfl [vmem:[#allocation1 + $0x28] sm:$0xff pattern:$0x75316420]  ;;  %v456_v21 = vsel %vm427_vm0, %v355_v15, -inf }
  0x71   : > { %v444_v23 = vmax.f32 %v442_v12, %v443_v13  ;;  %v457_v24 = vrot.slane %v456_v21, 4  ;;  %v463_v25 = vsel %vm427_vm0, %v356_v20, -inf  ;;  %v357_v26 = vld.sshfl [vmem:[#allocation1 + $0x30] sm:$0xff pattern:$0x75316420] }
  0x72   : > { %v431_v28 = vrot.slane %v430_v17, 2  ;;  %v438_v29 = vrot.slane %v437_v18, 2  ;;  %v451_v30 = vmax.f32 %v449_v14, %v450_v19  ;;  %v464_v31 = vrot.slane %v463_v25, 4  ;;  %v358_v32 = vld.sshfl [vmem:[#allocation1 + $0x38] sm:$0xff pattern:$0x75316420] }
  0x73   : > { %v445_v33 = vrot.slane %v444_v23, 2  ;;  %v458_v34 = vmax.f32 %v456_v21, %v457_v24  ;;  %v470_v35 = vsel %vm427_vm0, %v357_v26, -inf  ;;  %v477_v36 = vsel %vm427_vm0, %v358_v32, -inf  ;;  %359 = vst [vmem:[#allocation1] ss:$2 sm:$0xff] %v2670_v16 }
  0x74   : > { %v432_v38 = vmax.f32 %v430_v17, %v431_v28  ;;  %v439_v39 = vmax.f32 %v437_v18, %v438_v29  ;;  %v452_v40 = vrot.slane %v451_v30, 2  ;;  %v465_v41 = vmax.f32 %v463_v25, %v464_v31  ;;  %360 = vst [vmem:[#allocation1 + $0x10] ss:$2 sm:$0xff] %v2674_v22  ;;  %v2695_v28 = vld [vmem:[%s2647_s4 + $0x40] sm:$0xff] }
  0x75   : > { %v446_v42 = vmax.f32 %v444_v23, %v445_v33  ;;  %v459_v43 = vrot.slane %v458_v34, 2  ;;  %v471_v44 = vrot.slane %v470_v35, 4  ;;  %v478_v45 = vrot.slane %v477_v36, 4  ;;  %361 = vst [vmem:[#allocation1 + $0x20] ss:$2 sm:$0xff] %v2678_v27 }
  0x76   : > { %v433_v46 = vrot.slane %v432_v38, 1  ;;  %v440_v47 = vrot.slane %v439_v39, 1  ;;  %v453_v48 = vmax.f32 %v451_v30, %v452_v40  ;;  %v466_v49 = vrot.slane %v465_v41, 2  ;;  %362 = vst [vmem:[#allocation1 + $0x30] ss:$2 sm:$0xff] %v2684_v37 }
  0x77   : > { %v447_v50 = vrot.slane %v446_v42, 1  ;;  %v460_v51 = vmax.f32 %v458_v34, %v459_v43  ;;  %v472_v52 = vmax.f32 %v470_v35, %v471_v44  ;;  %v479_v53 = vmax.f32 %v477_v36, %v478_v45  ;;  %v2699_v34 = vld [vmem:[%s2647_s4 + $0x48] sm:$0xff] }
  0x78   : > { %v441_v54 = vmax.f32 %v439_v39, %v440_v47  ;;  %v454_v55 = vrot.slane %v453_v48, 1  ;;  %v467_v56 = vmax.f32 %v465_v41, %v466_v49  ;;  %v434_v57 = vmax.f32 %v432_v38, %v433_v46  ;;  %v2704_v41 = vld [vmem:[%s2647_s4 + $0x50] sm:$0xff]  ;;  %v2710_v49 = vld [vmem:[%s2647_s4 + $0x58] sm:$0xff] }
  0x79   : > { %v461_v58 = vrot.slane %v460_v51, 1  ;;  %v473_v59 = vrot.slane %v472_v52, 2  ;;  %v480_v60 = vrot.slane %v479_v53, 2  ;;  %v448_v62 = vmax.f32 %v446_v42, %v447_v50 }
  0x7a   : > { %v684_v61 = vrot.slane %v441_v54, 4  ;;  %v455_v63 = vmax.f32 %v453_v48, %v454_v55  ;;  %v468_v4 = vrot.slane %v467_v56, 1  ;;  %v363_v5 = vld.sshfl [vmem:[#allocation1] sm:$0xff pattern:$0x75316420] }
  0x7b   : > { %v462_v6 = vmax.f32 %v460_v51, %v461_v58  ;;  %v474_v7 = vmax.f32 %v472_v52, %v473_v59  ;;  %v481_v8 = vmax.f32 %v479_v53, %v480_v60  ;;  %v364_v9 = vld.sshfl [vmem:[#allocation1 + $0x8] sm:$0xff pattern:$0x75316420]  ;;  %v484_v10 = vsel %vm427_vm0, %v363_v5, -inf }
  0x7c   : > { %v700_v11 = vsel %vm427_vm0, %v434_v57, %v684_v61  ;;  %v685_v12 = vrot.slane %v455_v63, 4  ;;  %v469_v13 = vmax.f32 %v467_v56, %v468_v4  ;;  %v485_v14 = vrot.slane %v484_v10, 4  ;;  %v365_v20 = vld.sshfl [vmem:[#allocation1 + $0x10] sm:$0xff pattern:$0x75316420] }
  0x7d   : > { %v732_v15 = vsub.f32 %v2650_v0, %v700_v11  ;;  %v475_v17 = vrot.slane %v474_v7, 1  ;;  %v482_v18 = vrot.slane %v481_v8, 1  ;;  %v491_v19 = vsel %vm427_vm0, %v364_v9, -inf  ;;  %v366_v26 = vld.sshfl [vmem:[#allocation1 + $0x18] sm:$0xff pattern:$0x75316420] }
  0x7e   : > { %v701_v21 = vsel %vm427_vm0, %v448_v62, %v685_v12  ;;  %v686_v23 = vrot.slane %v469_v13, 4  ;;  %v486_v24 = vmax.f32 %v484_v10, %v485_v14  ;;  %v492_v25 = vrot.slane %v491_v19, 4  ;;  %v367_v32 = vld.sshfl [vmem:[#allocation1 + $0x20] sm:$0xff pattern:$0x75316420] }
  0x7f   : > { %v748_v29 = vmul.f32 1.442695, %v732_v15  ;;  %v733_v30 = vsub.f32 %v2653_v1, %v701_v21  ;;  %v476_v31 = vmax.f32 %v474_v7, %v475_v17  ;;  %v483_v0 = vmax.f32 %v481_v8, %v482_v18  ;;  %v368_v33 = vld.sshfl [vmem:[#allocation1 + $0x28] sm:$0xff pattern:$0x75316420]  ;;  %v2723_v10 = vld [vmem:[%s2647_s4 + $0x60] sm:$0xff] }
  0x80   : > { %v702_v35 = vsel %vm427_vm0, %v462_v6, %v686_v23  ;;  %v487_v36 = vrot.slane %v486_v24, 2  ;;  %v493_v38 = vmax.f32 %v491_v19, %v492_v25  ;;  %v498_v39 = vsel %vm427_vm0, %v365_v20, -inf  ;;  %v369_v40 = vld.sshfl [vmem:[#allocation1 + $0x30] sm:$0xff pattern:$0x75316420] }
  0x81   : > { %2281 = vpow2.f32 %v748_v29  ;;  %v750_v42 = vmul.f32 1.442695, %v733_v30  ;;  %v734_v1 = vsub.f32 %v2656_v2, %v702_v35  ;;  %v687_v43 = vrot.slane %v483_v0, 4  ;;  %v370_v44 = vld.sshfl [vmem:[#allocation1 + $0x38] sm:$0xff pattern:$0x75316420] }
  0x82   : > { %v488_v45 = vmax.f32 %v486_v24, %v487_v36  ;;  %v494_v46 = vrot.slane %v493_v38, 2  ;;  %v499_v47 = vrot.slane %v498_v39, 4  ;;  %v505_v48 = vsel %vm427_vm0, %v366_v26, -inf  ;;  %371 = vst [vmem:[#allocation1] ss:$2 sm:$0xff] %v2695_v28 }
  0x83   : > { %2283 = vpow2.f32 %v750_v42  ;;  %v752_v50 = vmul.f32 1.442695, %v734_v1  ;;  %v703_v51 = vsel %vm427_vm0, %v476_v31, %v687_v43  ;;  %v506_v52 = vrot.slane %v505_v48, 4  ;;  %372 = vst [vmem:[#allocation1 + $0x10] ss:$2 sm:$0xff] %v2699_v34  ;;  %v2735_v42 = vld [vmem:[%s2647_s4 + $0x68] sm:$0xff] }
  0x84   : > { %v735_v2 = vsub.f32 %v2660_v3, %v703_v51  ;;  %v489_v53 = vrot.slane %v488_v45, 1  ;;  %v495_v54 = vmax.f32 %v493_v38, %v494_v46  ;;  %v500_v55 = vmax.f32 %v498_v39, %v499_v47  ;;  %373 = vst [vmem:[#allocation1 + $0x20] ss:$2 sm:$0xff] %v2704_v41 }
  0x85   : > { %2285 = vpow2.f32 %v752_v50  ;;  %v507_v56 = vmax.f32 %v505_v48, %v506_v52  ;;  %v512_v57 = vsel %vm427_vm0, %v367_v32, -inf  ;;  %v519_v58 = vsel %vm427_vm0, %v368_v33, -inf  ;;  %374 = vst [vmem:[#allocation1 + $0x30] ss:$2 sm:$0xff] %v2710_v49 }
  0x86   : > { %v754_v59 = vmul.f32 1.442695, %v735_v2  ;;  %v490_v60 = vmax.f32 %v488_v45, %v489_v53  ;;  %v496_v61 = vrot.slane %v495_v54, 1  ;;  %v501_v62 = vrot.slane %v500_v55, 2 }
  0x87   : > { %v2719_v63 = vpop.eup %2281  ;;  %v508_v3 = vrot.slane %v507_v56, 2  ;;  %v513_v4 = vrot.slane %v512_v57, 4  ;;  %v520_v5 = vrot.slane %v519_v58, 4  ;;  %v526_v6 = vsel %vm427_vm0, %v369_v40, -inf }
  0x88   : > { %2287 = vpow2.f32 %v754_v59  ;;  %v497_v7 = vmax.f32 %v495_v54, %v496_v61  ;;  %v502_v8 = vmax.f32 %v500_v55, %v501_v62  ;;  %v527_v9 = vrot.slane %v526_v6, 4  ;;  %v2743_v62 = vld [vmem:[%s2647_s4 + $0x70] sm:$0xff] }
  0x89   : > { %v2725_v11 = vpop.eup %2283  ;;  %v509_v12 = vmax.f32 %v507_v56, %v508_v3  ;;  %v514_v13 = vmax.f32 %v512_v57, %v513_v4  ;;  %v521_v14 = vmax.f32 %v519_v58, %v520_v5  ;;  %v533_v15 = vsel %vm427_vm0, %v370_v44, -inf  ;;  %v375_v17 = vld.sshfl [vmem:[#allocation1] sm:$0xff pattern:$0x75316420] }
  0x8a   : > { %v688_v18 = vrot.slane %v497_v7, 4  ;;  %v503_v19 = vrot.slane %v502_v8, 1  ;;  %v528_v20 = vmax.f32 %v526_v6, %v527_v9  ;;  %v534_v21 = vrot.slane %v533_v15, 4  ;;  %v376_v23 = vld.sshfl [vmem:[#allocation1 + $0x8] sm:$0xff pattern:$0x75316420] }
  0x8b   : > { %v2728_v24 = vpop.eup %2285  ;;  %v510_v25 = vrot.slane %v509_v12, 1  ;;  %v515_v26 = vrot.slane %v514_v13, 2  ;;  %v522_v29 = vrot.slane %v521_v14, 2  ;;  %v540_v30 = vsel %vm427_vm0, %v375_v17, -inf  ;;  %383 = vst [vmem:[#allocation1] ss:$2 sm:$0xff] %v2723_v10 }
  0x8c   : > { %v704_v31 = vsel %vm427_vm0, %v490_v60, %v688_v18  ;;  %v504_v0 = vmax.f32 %v502_v8, %v503_v19  ;;  %v529_v32 = vrot.slane %v528_v20, 2  ;;  %v535_v33 = vmax.f32 %v533_v15, %v534_v21  ;;  %v377_v40 = vld.sshfl [vmem:[#allocation1 + $0x10] sm:$0xff pattern:$0x75316420]  ;;  %v2749_v8 = vld [vmem:[%s2647_s4 + $0x78] sm:$0xff] }
  0x8d   : > { %v736_v35 = vsub.f32 %v2670_v16, %v704_v31  ;;  %v511_v36 = vmax.f32 %v509_v12, %v510_v25  ;;  %v516_v38 = vmax.f32 %v514_v13, %v515_v26  ;;  %v523_v39 = vmax.f32 %v521_v14, %v522_v29  ;;  %v378_v47 = vld.sshfl [vmem:[#allocation1 + $0x18] sm:$0xff pattern:$0x75316420]  ;;  %v379_v55 = vld.sshfl [vmem:[#allocation1 + $0x20] sm:$0xff pattern:$0x75316420] }
  0x8e   : > { %v2737_v1 = vpop.eup %2287  ;;  %v530_v43 = vmax.f32 %v528_v20, %v529_v32  ;;  %v536_v44 = vrot.slane %v535_v33, 2  ;;  %v541_v45 = vrot.slane %v540_v30, 4  ;;  %v547_v46 = vsel %vm427_vm0, %v376_v23, -inf  ;;  %v380_v56 = vld.sshfl [vmem:[#allocation1 + $0x28] sm:$0xff pattern:$0x75316420] }
  0x8f   : > { %v756_v48 = vmul.f32 1.442695, %v736_v35  ;;  %v689_v50 = vrot.slane %v511_v36, 4  ;;  %v517_v51 = vrot.slane %v516_v38, 1  ;;  %v524_v52 = vrot.slane %v523_v39, 1 }
  0x90   : > { %v531_v16 = vrot.slane %v530_v43, 1  ;;  %v537_v2 = vmax.f32 %v535_v33, %v536_v44  ;;  %v542_v53 = vmax.f32 %v540_v30, %v541_v45  ;;  %v548_v54 = vrot.slane %v547_v46, 4  ;;  %v381_v60 = vld.sshfl [vmem:[#allocation1 + $0x30] sm:$0xff pattern:$0x75316420] }
  0x91   : > { %2289 = vpow2.f32 %v756_v48  ;;  %v705_v57 = vsel %vm427_vm0, %v504_v0, %v689_v50  ;;  %v518_v58 = vmax.f32 %v516_v38, %v517_v51  ;;  %v525_v59 = vmax.f32 %v523_v39, %v524_v52  ;;  %v382_v61 = vld.sshfl [vmem:[#allocation1 + $0x38] sm:$0xff pattern:$0x75316420]  ;;  %384 = vst [vmem:[#allocation1 + $0x10] ss:$2 sm:$0xff] %v2735_v42 }
  0x92   : > { %v737_v3 = vsub.f32 %v2674_v22, %v705_v57  ;;  %v532_v4 = vmax.f32 %v530_v43, %v531_v16  ;;  %v538_v5 = vrot.slane %v537_v2, 1  ;;  %v543_v6 = vrot.slane %v542_v53, 2  ;;  %v2746_v7 = vld.sshfl [vmem:[#allocation1] sm:$0xff pattern:$0x75316420] }
  0x93   : > { %v690_v9 = vrot.slane %v525_v59, 4  ;;  %v549_v12 = vmax.f32 %v547_v46, %v548_v54  ;;  %v554_v13 = vsel %vm427_vm0, %v377_v40, -inf  ;;  %v561_v14 = vsel %vm427_vm0, %v378_v47, -inf  ;;  %v2753_v15 = vld.sshfl [vmem:[#allocation1 + $0x8] sm:$0xff pattern:$0x75316420] }
  0x94   : > { %v758_v17 = vmul.f32 1.442695, %v737_v3  ;;  %v539_v18 = vmax.f32 %v537_v2, %v538_v5  ;;  %v544_v19 = vmax.f32 %v542_v53, %v543_v6  ;;  %v555_v20 = vrot.slane %v554_v13, 4  ;;  %796 = vst [vmem:[#allocation1] ss:$2 sm:$0xff] %v2719_v63 }
  0x95   : > { %v706_v22 = vsel %vm427_vm0, %v518_v58, %v690_v9  ;;  %v550_v21 = vrot.slane %v549_v12, 2  ;;  %v562_v23 = vrot.slane %v561_v14, 4  ;;  %v568_v25 = vsel %vm427_vm0, %v379_v55, -inf  ;;  %385 = vst [vmem:[#allocation1 + $0x20] ss:$2 sm:$0xff] %v2743_v62 }
  0x96   : > { %2291 = vpow2.f32 %v758_v17  ;;  %v738_v26 = vsub.f32 %v2678_v27, %v706_v22  ;;  %v691_v29 = vrot.slane %v539_v18, 4  ;;  %v545_v30 = vrot.slane %v544_v19, 1  ;;  %386 = vst [vmem:[#allocation1 + $0x30] ss:$2 sm:$0xff] %v2749_v8 }
  0x97   : > { %v2761_v31 = vpop.eup %2289  ;;  %v551_v0 = vmax.f32 %v549_v12, %v550_v21  ;;  %v556_v32 = vmax.f32 %v554_v13, %v555_v20  ;;  %v563_v33 = vmax.f32 %v561_v14, %v562_v23  ;;  %v569_v35 = vrot.slane %v568_v25, 4 }
  0x98   : > { %v760_v36 = vmul.f32 1.442695, %v738_v26  ;;  %v707_v38 = vsel %vm427_vm0, %v532_v4, %v691_v29  ;;  %v546_v39 = vmax.f32 %v544_v19, %v545_v30  ;;  %v575_v40 = vsel %vm427_vm0, %v380_v56, -inf  ;;  %v2765_v43 = vld.sshfl [vmem:[#allocation1 + $0x10] sm:$0xff pattern:$0x75316420] }
  0x99   : > { %v739_v27 = vsub.f32 %v2684_v37, %v707_v38  ;;  %v552_v44 = vrot.slane %v551_v0, 1  ;;  %v557_v45 = vrot.slane %v556_v32, 2  ;;  %v564_v46 = vrot.slane %v563_v33, 2  ;;  %v2768_v47 = vld.sshfl [vmem:[#allocation1 + $0x18] sm:$0xff pattern:$0x75316420] }
  0x9a   : > { %2293 = vpow2.f32 %v760_v36  ;;  %v570_v48 = vmax.f32 %v568_v25, %v569_v35  ;;  %v576_v50 = vrot.slane %v575_v40, 4  ;;  %v582_v51 = vsel %vm427_vm0, %v381_v60, -inf  ;;  %798 = vst [vmem:[#allocation1 + $0x10] ss:$2 sm:$0xff] %v2725_v11 }
  0x9b   : > { %v762_v52 = vmul.f32 1.442695, %v739_v27  ;;  %v553_v16 = vmax.f32 %v551_v0, %v552_v44  ;;  %v558_v2 = vmax.f32 %v556_v32, %v557_v45  ;;  %v565_v53 = vmax.f32 %v563_v33, %v564_v46  ;;  %v2785_v19 = vld.sshfl [vmem:[#allocation1] sm:$0xff pattern:$0x75316420] }
  0x9c   : > { %v2772_v54 = vpop.eup %2291  ;;  %v571_v55 = vrot.slane %v570_v48, 2  ;;  %v577_v37 = vmax.f32 %v575_v40, %v576_v50  ;;  %v583_v56 = vrot.slane %v582_v51, 4  ;;  %v589_v57 = vsel %vm427_vm0, %v382_v61, -inf  ;;  %v2775_v58 = vld.sshfl [vmem:[#allocation1 + $0x20] sm:$0xff pattern:$0x75316420] }
  0x9d   : > { %2295 = vpow2.f32 %v762_v52  ;;  %v692_v59 = vrot.slane %v553_v16, 4  ;;  %v559_v3 = vrot.slane %v558_v2, 1  ;;  %v566_v4 = vrot.slane %v565_v53, 1  ;;  %v2777_v60 = vld.sshfl [vmem:[#allocation1 + $0x28] sm:$0xff pattern:$0x75316420] }
  0x9e   : > { %v572_v5 = vmax.f32 %v570_v48, %v571_v55  ;;  %v578_v6 = vrot.slane %v577_v37, 2  ;;  %v584_v9 = vmax.f32 %v582_v51, %v583_v56  ;;  %v590_v12 = vrot.slane %v589_v57, 4  ;;  %800 = vst [vmem:[#allocation1 + $0x20] ss:$2 sm:$0xff] %v2728_v24 }
  0x9f   : > { %v708_v13 = vsel %vm427_vm0, %v546_v39, %v692_v59  ;;  %v560_v14 = vmax.f32 %v558_v2, %v559_v3  ;;  %v567_v17 = vmax.f32 %v565_v53, %v566_v4  ;;  %v596_v61 = vsel %vm427_vm0, %v2746_v7, -inf  ;;  %v2783_v18 = vld.sshfl [vmem:[#allocation1 + $0x30] sm:$0xff pattern:$0x75316420] }
  0xa0   : > { %v2787_v20 = vpop.eup %2293  ;;  %v740_v22 = vsub.f32 %v2695_v28, %v708_v13  ;;  %v573_v21 = vrot.slane %v572_v5, 1  ;;  %v579_v23 = vmax.f32 %v577_v37, %v578_v6  ;;  %v585_v25 = vrot.slane %v584_v9, 2  ;;  %v2790_v26 = vld.sshfl [vmem:[#allocation1 + $0x38] sm:$0xff pattern:$0x75316420] }
  0xa1   : > { %v693_v29 = vrot.slane %v567_v17, 4  ;;  %v591_v30 = vmax.f32 %v589_v57, %v590_v12  ;;  %v597_v0 = vrot.slane %v596_v61, 4  ;;  %v603_v32 = vsel %vm427_vm0, %v2753_v15, -inf  ;;  %802 = vst [vmem:[#allocation1 + $0x30] ss:$2 sm:$0xff] %v2737_v1 }
  0xa2   : > { %v764_v7 = vmul.f32 1.442695, %v740_v22  ;;  %v574_v33 = vmax.f32 %v572_v5, %v573_v21  ;;  %v580_v35 = vrot.slane %v579_v23, 1  ;;  %v586_v36 = vmax.f32 %v584_v9, %v585_v25  ;;  %v2795_v38 = vld.sshfl [vmem:[#allocation1 + $0x8] sm:$0xff pattern:$0x75316420] }
  0xa3   : > { %v2797_v28 = vpop.eup %2295  ;;  %v709_v39 = vsel %vm427_vm0, %v560_v14, %v693_v29  ;;  %v592_v40 = vrot.slane %v591_v30, 2  ;;  %v598_v27 = vmax.f32 %v596_v61, %v597_v0  ;;  %v604_v44 = vrot.slane %v603_v32, 4  ;;  %v2800_v45 = vld.sshfl [vmem:[#allocation1 + $0x10] sm:$0xff pattern:$0x75316420] }
  0xa4   : > { %2297 = vpow2.f32 %v764_v7  ;;  %v741_v15 = vsub.f32 %v2699_v34, %v709_v39  ;;  %v581_v46 = vmax.f32 %v579_v23, %v580_v35  ;;  %v587_v48 = vrot.slane %v586_v36, 1  ;;  %v2803_v50 = vld.sshfl [vmem:[#allocation1 + $0x18] sm:$0xff pattern:$0x75316420]  ;;  %811 = vst [vmem:[#allocation1] ss:$2 sm:$0xff] %v2761_v31 }
  0xa5   : > { %v593_v51 = vmax.f32 %v591_v30, %v592_v40  ;;  %v599_v52 = vrot.slane %v598_v27, 2  ;;  %v605_v16 = vmax.f32 %v603_v32, %v604_v44  ;;  %v610_v2 = vsel %vm427_vm0, %v2765_v43, -inf  ;;  %v2808_v53 = vld.sshfl [vmem:[#allocation1 + $0x20] sm:$0xff pattern:$0x75316420] }
  0xa6   : > { %v766_v55 = vmul.f32 1.442695, %v741_v15  ;;  %v694_v37 = vrot.slane %v581_v46, 4  ;;  %v588_v56 = vmax.f32 %v586_v36, %v587_v48  ;;  %v611_v57 = vrot.slane %v610_v2, 4  ;;  %812 = vst [vmem:[#allocation1 + $0x10] ss:$2 sm:$0xff] %v2772_v54 }
  0xa7   : > { %v594_v34 = vrot.slane %v593_v51, 1  ;;  %v600_v59 = vmax.f32 %v598_v27, %v599_v52  ;;  %v606_v3 = vrot.slane %v605_v16, 2  ;;  %v617_v4 = vsel %vm427_vm0, %v2768_v47, -inf  ;;  %v2813_v5 = vld.sshfl [vmem:[#allocation1 + $0x28] sm:$0xff pattern:$0x75316420] }
  0xa8   : > { %2299 = vpow2.f32 %v766_v55  ;;  %v710_v6 = vsel %vm427_vm0, %v574_v33, %v694_v37  ;;  %v612_v43 = vmax.f32 %v610_v2, %v611_v57  ;;  %v618_v9 = vrot.slane %v617_v4, 4  ;;  %v2816_v12 = vld.sshfl [vmem:[#allocation1 + $0x30] sm:$0xff pattern:$0x75316420]  ;;  %813 = vst [vmem:[#allocation1 + $0x20] ss:$2 sm:$0xff] %v2787_v20 }
  0xa9   : > { %v742_v13 = vsub.f32 %v2704_v41, %v710_v6  ;;  %v595_v14 = vmax.f32 %v593_v51, %v594_v34  ;;  %v601_v17 = vrot.slane %v600_v59, 1  ;;  %v607_v61 = vmax.f32 %v605_v16, %v606_v3  ;;  %v2820_v22 = vld.sshfl [vmem:[#allocation1 + $0x38] sm:$0xff pattern:$0x75316420] }
  0xaa   : > { %v2822_v21 = vpop.eup %2297  ;;  %v613_v47 = vrot.slane %v612_v43, 2  ;;  %v619_v23 = vmax.f32 %v617_v4, %v618_v9  ;;  %v624_v25 = vsel %vm427_vm0, %v2775_v58, -inf  ;;  %v631_v29 = vsel %vm427_vm0, %v2777_v60, -inf  ;;  %814 = vst [vmem:[#allocation1 + $0x30] ss:$2 sm:$0xff] %v2797_v28 }
  0xab   : > { %v768_v30 = vmul.f32 1.442695, %v742_v13  ;;  %v695_v0 = vrot.slane %v595_v14, 4  ;;  %v602_v41 = vmax.f32 %v600_v59, %v601_v17  ;;  %v608_v32 = vrot.slane %v607_v61, 1 }
  0xac   : > { %v614_v7 = vmax.f32 %v612_v43, %v613_v47  ;;  %v620_v33 = vrot.slane %v619_v23, 2  ;;  %v625_v35 = vrot.slane %v624_v25, 4  ;;  %v632_v36 = vrot.slane %v631_v29, 4  ;;  %v2829_v39 = vld.sshfl [vmem:[#allocation1] sm:$0xff pattern:$0x75316420] }
  0xad   : > { %2301 = vpow2.f32 %v768_v30  ;;  %v711_v40 = vsel %vm427_vm0, %v588_v56, %v695_v0  ;;  %v609_v27 = vmax.f32 %v607_v61, %v608_v32  ;;  %v638_v58 = vsel %vm427_vm0, %v2783_v18, -inf  ;;  %v2834_v60 = vld.sshfl [vmem:[#allocation1 + $0x8] sm:$0xff pattern:$0x75316420] }
  0xae   : > { %v2836_v44 = vpop.eup %2299  ;;  %v743_v15 = vsub.f32 %v2710_v49, %v711_v40  ;;  %v615_v46 = vrot.slane %v614_v7, 1  ;;  %v621_v48 = vmax.f32 %v619_v23, %v620_v33  ;;  %v626_v51 = vmax.f32 %v624_v25, %v625_v35  ;;  %v2839_v52 = vld.sshfl [vmem:[#allocation1 + $0x10] sm:$0xff pattern:$0x75316420]  ;;  %823 = vst [vmem:[#allocation1] ss:$2 sm:$0xff] %v2822_v21 }
  0xaf   : > { %v696_v16 = vrot.slane %v609_v27, 4  ;;  %v633_v2 = vmax.f32 %v631_v29, %v632_v36  ;;  %v639_v55 = vrot.slane %v638_v58, 4  ;;  %v645_v37 = vsel %vm427_vm0, %v2790_v26, -inf  ;;  %v2844_v18 = vld.sshfl [vmem:[#allocation1 + $0x18] sm:$0xff pattern:$0x75316420] }
  0xb0   : > { %v770_v56 = vmul.f32 1.442695, %v743_v15  ;;  %v616_v57 = vmax.f32 %v614_v7, %v615_v46  ;;  %v622_v34 = vrot.slane %v621_v48, 1  ;;  %v627_v59 = vrot.slane %v626_v51, 2  ;;  %824 = vst [vmem:[#allocation1 + $0x10] ss:$2 sm:$0xff] %v2836_v44 }
  0xb1   : > { %v712_v49 = vsel %vm427_vm0, %v602_v41, %v696_v16  ;;  %v634_v3 = vrot.slane %v633_v2, 2  ;;  %v640_v4 = vmax.f32 %v638_v58, %v639_v55  ;;  %v646_v6 = vrot.slane %v645_v37, 4  ;;  %v2849_v14 = vld.sshfl [vmem:[#allocation1 + $0x20] sm:$0xff pattern:$0x75316420] }
  0xb2   : > { %2303 = vpow2.f32 %v770_v56  ;;  %v744_v43 = vsub.f32 %v2723_v10, %v712_v49  ;;  %v623_v9 = vmax.f32 %v621_v48, %v622_v34  ;;  %v628_v13 = vmax.f32 %v626_v51, %v627_v59  ;;  %v2851_v26 = vld.sshfl [vmem:[#allocation1 + $0x28] sm:$0xff pattern:$0x75316420]  ;;  %v2861_v27 = vld.sshfl [vmem:[#allocation1 + $0x30] sm:$0xff pattern:$0x75316420] }
  0xb3   : > { %v2853_v17 = vpop.eup %2301  ;;  %v635_v61 = vmax.f32 %v633_v2, %v634_v3  ;;  %v641_v47 = vrot.slane %v640_v4, 2  ;;  %v647_v23 = vmax.f32 %v645_v37, %v646_v6  ;;  %v879_v25 = vsel %vm427_vm0, %v2785_v19, 0.0  ;;  %v2863_v19 = vld.sshfl [vmem:[#allocation1 + $0x38] sm:$0xff pattern:$0x75316420] }
  0xb4   : > { %v772_v29 = vmul.f32 1.442695, %v744_v43  ;;  %v697_v30 = vrot.slane %v623_v9, 4  ;;  %v629_v0 = vrot.slane %v628_v13, 1  ;;  %v880_v41 = vrot.slane %v879_v25, 4 }
  0xb5   : > { %v636_v32 = vrot.slane %v635_v61, 1  ;;  %v642_v10 = vmax.f32 %v640_v4, %v641_v47  ;;  %v648_v7 = vrot.slane %v647_v23, 2  ;;  %v886_v33 = vsel %vm427_vm0, %v2795_v38, 0.0  ;;  %825 = vst [vmem:[#allocation1 + $0x20] ss:$2 sm:$0xff] %v2853_v17 }
  0xb6   : > { %2305 = vpow2.f32 %v772_v29  ;;  %v713_v35 = vsel %vm427_vm0, %v616_v57, %v697_v30  ;;  %v630_v36 = vmax.f32 %v628_v13, %v629_v0  ;;  %v881_v40 = vadd.f32 %v880_v41, %v879_v25  ;;  %v2879_v47 = vld.sshfl [vmem:[#allocation1] sm:$0xff pattern:$0x75316420]  ;;  %v2883_v0 = vld.sshfl [vmem:[#allocation1 + $0x8] sm:$0xff pattern:$0x75316420] }
  0xb7   : > { %v745_v58 = vsub.f32 %v2735_v42, %v713_v35  ;;  %v637_v15 = vmax.f32 %v635_v61, %v636_v32  ;;  %v643_v46 = vrot.slane %v642_v10, 1  ;;  %v649_v48 = vmax.f32 %v647_v23, %v648_v7  ;;  %v2885_v7 = vld.sshfl [vmem:[#allocation1 + $0x10] sm:$0xff pattern:$0x75316420] }
  0xb8   : > { %v2866_v51 = vpop.eup %2303  ;;  %v882_v16 = vrot.slane %v881_v40, 2  ;;  %v887_v38 = vrot.slane %v886_v33, 4  ;;  %v893_v2 = vsel %vm427_vm0, %v2800_v45, 0.0  ;;  %v900_v55 = vsel %vm427_vm0, %v2803_v50, 0.0 }
  0xb9   : > { %v774_v37 = vmul.f32 1.442695, %v745_v58  ;;  %v698_v56 = vrot.slane %v637_v15, 4  ;;  %v644_v57 = vmax.f32 %v642_v10, %v643_v46  ;;  %v650_v34 = vrot.slane %v649_v48, 1  ;;  %826 = vst [vmem:[#allocation1 + $0x30] ss:$2 sm:$0xff] %v2866_v51 }
  0xba   : > { %v883_v42 = vadd.f32 %v882_v16, %v881_v40  ;;  %v888_v59 = vadd.f32 %v887_v38, %v886_v33  ;;  %v894_v49 = vrot.slane %v893_v2, 4  ;;  %v901_v3 = vrot.slane %v900_v55, 4  ;;  %v2888_v40 = vld.sshfl [vmem:[#allocation1 + $0x18] sm:$0xff pattern:$0x75316420] }
  0xbb   : > { %2307 = vpow2.f32 %v774_v37  ;;  %v714_v4 = vsel %vm427_vm0, %v630_v36, %v698_v56  ;;  %v651_v6 = vmax.f32 %v649_v48, %v650_v34  ;;  %v907_v45 = vsel %vm427_vm0, %v2808_v53, 0.0 }
  0xbc   : > { %v2876_v43 = vpop.eup %2305  ;;  %v746_v50 = vsub.f32 %v2743_v62, %v714_v4  ;;  %v884_v9 = vrot.slane %v883_v42, 1  ;;  %v889_v13 = vrot.slane %v888_v59, 2  ;;  %v895_v61 = vadd.f32 %v894_v49, %v893_v2  ;;  %v2899_v49 = vld.sshfl [vmem:[#allocation1 + $0x20] sm:$0xff pattern:$0x75316420] }
  0xbd   : > { %3387 = vst [vmem:[#allocation6_spill] sm:$0xff] %v2876_v43  ;;  %v699_v23 = vrot.slane %v651_v6, 4  ;;  %v902_v25 = vadd.f32 %v901_v3, %v900_v55  ;;  %v908_v29 = vrot.slane %v907_v45, 4  ;;  %v914_v30 = vsel %vm427_vm0, %v2813_v5, 0.0 }
  0xbe   : > { %v776_v41 = vmul.f32 1.442695, %v746_v50  ;;  %v885_v32 = vadd.f32 %v884_v9, %v883_v42  ;;  %v890_v53 = vadd.f32 %v889_v13, %v888_v59  ;;  %v896_v10 = vrot.slane %v895_v61, 2  ;;  %835 = vst [vmem:[#allocation1] ss:$2 sm:$0xff] %v2876_v43 }
  0xbf   : > { %v715_v62 = vsel %vm427_vm0, %v644_v57, %v699_v23  ;;  %v903_v33 = vrot.slane %v902_v25, 2  ;;  %v909_v35 = vadd.f32 %v908_v29, %v907_v45  ;;  %v915_v36 = vrot.slane %v914_v30, 4  ;;  %v2901_v45 = vld.sshfl [vmem:[#allocation1 + $0x28] sm:$0xff pattern:$0x75316420] }
  0xc0   : > { %2309 = vpow2.f32 %v776_v41  ;;  %v747_v58 = vsub.f32 %v2749_v8, %v715_v62  ;;  %v891_v15 = vrot.slane %v890_v53, 1  ;;  %v897_v5 = vadd.f32 %v896_v10, %v895_v61  ;;  %v2912_v62 = vld.sshfl [vmem:[#allocation1 + $0x38] sm:$0xff pattern:$0x75316420] }
  0xc1   : > { %v2892_v46 = vpop.eup %2307  ;;  %v904_v48 = vadd.f32 %v903_v33, %v902_v25  ;;  %v910_v16 = vrot.slane %v909_v35, 2  ;;  %v916_v38 = vadd.f32 %v915_v36, %v914_v30  ;;  %v921_v2 = vsel %vm427_vm0, %v2816_v12, 0.0  ;;  %v2907_v25 = vld.sshfl [vmem:[#allocation1 + $0x30] sm:$0xff pattern:$0x75316420] }
  0xc2   : > { %3388 = vst [vmem:[#allocation7_spill] sm:$0xff] %v2892_v46  ;;  %v778_v55 = vmul.f32 1.442695, %v747_v58  ;;  %v892_v37 = vadd.f32 %v891_v15, %v890_v53  ;;  %v898_v56 = vrot.slane %v897_v5, 1  ;;  %v922_v57 = vrot.slane %v921_v2, 4 }
  0xc3   : > { %836 = vst [vmem:[#allocation1 + $0x10] ss:$2 sm:$0xff] %v2892_v46  ;;  %v905_v34 = vrot.slane %v904_v48, 1  ;;  %v911_v8 = vadd.f32 %v910_v16, %v909_v35  ;;  %v917_v42 = vrot.slane %v916_v38, 2  ;;  %v928_v59 = vsel %vm427_vm0, %v2820_v22, 0.0 }
  0xc4   : > { %2311 = vpow2.f32 %v778_v55  ;;  %v899_v3 = vadd.f32 %v898_v56, %v897_v5  ;;  %v923_v4 = vadd.f32 %v922_v57, %v921_v2  ;;  %v929_v6 = vrot.slane %v928_v59, 4 }
  0xc5   : > { %v906_v12 = vadd.f32 %v905_v34, %v904_v48  ;;  %v912_v50 = vrot.slane %v911_v8, 1  ;;  %v918_v9 = vadd.f32 %v917_v42, %v916_v38  ;;  %2313 = vrcp.f32 %v885_v32 }
  0xc6   : > { %v2903_v13 = vpop.eup %2309  ;;  %v924_v61 = vrot.slane %v923_v4, 2  ;;  %v930_v23 = vadd.f32 %v929_v6, %v928_v59  ;;  %2315 = vrcp.f32 %v892_v37  ;;  %v935_v22 = vsel %vm427_vm0, %v2829_v39, 0.0 }
  0xc7   : > { %3389 = vst [vmem:[#allocation8_spill] sm:$0xff] %v2903_v13  ;;  %v913_v29 = vadd.f32 %v912_v50, %v911_v8  ;;  %v919_v30 = vrot.slane %v918_v9, 1  ;;  %2317 = vrcp.f32 %v899_v3  ;;  %v936_v41 = vrot.slane %v935_v22, 4 }
  0xc8   : > { %837 = vst [vmem:[#allocation1 + $0x20] ss:$2 sm:$0xff] %v2903_v13  ;;  %v925_v53 = vadd.f32 %v924_v61, %v923_v4  ;;  %v931_v10 = vrot.slane %v930_v23, 2  ;;  %2319 = vrcp.f32 %v906_v12  ;;  %v942_v32 = vsel %vm427_vm0, %v2834_v60, 0.0 }
  0xc9   : > { %v920_v33 = vadd.f32 %v919_v30, %v918_v9  ;;  %2321 = vrcp.f32 %v913_v29  ;;  %v937_v35 = vadd.f32 %v936_v41, %v935_v22  ;;  %v943_v39 = vrot.slane %v942_v32, 4 }
  0xca   : > { %v2914_v36 = vpop.eup %2311  ;;  %v926_v58 = vrot.slane %v925_v53, 1  ;;  %v932_v15 = vadd.f32 %v931_v10, %v930_v23  ;;  %v949_v5 = vsel %vm427_vm0, %v2839_v52, 0.0  ;;  %v956_v48 = vsel %vm427_vm0, %v2844_v18, 0.0 }
  0xcb   : > { %3390 = vst [vmem:[#allocation9_spill] sm:$0xff] %v2914_v36  ;;  %v2920_v16 = vpop.eup %2313  ;;  %2323 = vrcp.f32 %v920_v33  ;;  %v938_v60 = vrot.slane %v937_v35, 2  ;;  %v944_v38 = vadd.f32 %v943_v39, %v942_v32  ;;  %v950_v2 = vrot.slane %v949_v5, 4 }
  0xcc   : > { %838 = vst [vmem:[#allocation1 + $0x30] ss:$2 sm:$0xff] %v2914_v36  ;;  %v2923_v55 = vpop.eup %2315  ;;  %v927_v37 = vadd.f32 %v926_v58, %v925_v53  ;;  %v933_v56 = vrot.slane %v932_v15, 1  ;;  %v957_v57 = vrot.slane %v956_v48, 4  ;;  %v963_v34 = vsel %vm427_vm0, %v2849_v14, 0.0 }
  0xcd   : > { %v2927_v52 = vpop.eup %2317  ;;  %v939_v8 = vadd.f32 %v938_v60, %v937_v35  ;;  %v945_v42 = vrot.slane %v944_v38, 2  ;;  %v951_v59 = vadd.f32 %v950_v2, %v949_v5  ;;  %v964_v12 = vrot.slane %v963_v34, 4 }
  0xce   : > { %v2930_v3 = vpop.eup %2319  ;;  %v934_v4 = vadd.f32 %v933_v56, %v932_v15  ;;  %2325 = vrcp.f32 %v927_v37  ;;  %v958_v6 = vadd.f32 %v957_v57, %v956_v48  ;;  %v970_v30 = vsel %vm427_vm0, %v2851_v26, 0.0 }
  0xcf   : > { %v2932_v50 = vpop.eup %2321  ;;  %v940_v61 = vrot.slane %v939_v8, 1  ;;  %v946_v23 = vadd.f32 %v945_v42, %v944_v38  ;;  %v952_v14 = vrot.slane %v951_v59, 2  ;;  %v965_v29 = vadd.f32 %v964_v12, %v963_v34 }
  0xd0   : > { %2327 = vrcp.f32 %v934_v4  ;;  %v959_v22 = vrot.slane %v958_v6, 2  ;;  %v971_v33 = vrot.slane %v970_v30, 4  ;;  %v977_v15 = vsel %vm427_vm0, %v2861_v27, 0.0 }
  0xd1   : > { %v2937_v41 = vpop.eup %2323  ;;  %v941_v53 = vadd.f32 %v940_v61, %v939_v8  ;;  %v947_v10 = vrot.slane %v946_v23, 1  ;;  %v953_v32 = vadd.f32 %v952_v14, %v951_v59  ;;  %v966_v58 = vrot.slane %v965_v29, 2 }
  0xd2   : > { %v960_v39 = vadd.f32 %v959_v22, %v958_v6  ;;  %v972_v60 = vadd.f32 %v971_v33, %v970_v30  ;;  %v978_v38 = vrot.slane %v977_v15, 4  ;;  %v984_v56 = vsel %vm427_vm0, %v2863_v19, 0.0 }
  0xd3   : > { %v948_v5 = vadd.f32 %v947_v10, %v946_v23  ;;  %v954_v48 = vrot.slane %v953_v32, 1  ;;  %v967_v37 = vadd.f32 %v966_v58, %v965_v29  ;;  %2329 = vrcp.f32 %v941_v53 }
  0xd4   : > { %v2942_v2 = vpop.eup %2325  ;;  %v961_v26 = vrot.slane %v960_v39, 1  ;;  %v973_v34 = vrot.slane %v972_v60, 2  ;;  %v979_v8 = vadd.f32 %v978_v38, %v977_v15  ;;  %v985_v42 = vrot.slane %v984_v56, 4 }
  0xd5   : > { %v955_v57 = vadd.f32 %v954_v48, %v953_v32  ;;  %v968_v27 = vrot.slane %v967_v37, 1  ;;  %2331 = vrcp.f32 %v948_v5  ;;  %v991_v6 = vsel %vm427_vm0, %v2879_v47, 0.0 }
  0xd6   : > { %v2946_v59 = vpop.eup %2327  ;;  %v962_v4 = vadd.f32 %v961_v26, %v960_v39  ;;  %v974_v61 = vadd.f32 %v973_v34, %v972_v60  ;;  %v980_v23 = vrot.slane %v979_v8, 2  ;;  %v986_v14 = vadd.f32 %v985_v42, %v984_v56 }
  0xd7   : > { %v969_v22 = vadd.f32 %v968_v27, %v967_v37  ;;  %2333 = vrcp.f32 %v955_v57  ;;  %v992_v19 = vrot.slane %v991_v6, 4  ;;  %v998_v29 = vsel %vm427_vm0, %v2883_v0, 0.0 }
  0xd8   : > { %v975_v30 = vrot.slane %v974_v61, 1  ;;  %v981_v53 = vadd.f32 %v980_v23, %v979_v8  ;;  %v987_v10 = vrot.slane %v986_v14, 2  ;;  %2335 = vrcp.f32 %v962_v4 }
  0xd9   : > { %v2953_v32 = vpop.eup %2329  ;;  %2337 = vrcp.f32 %v969_v22  ;;  %v993_v33 = vadd.f32 %v992_v19, %v991_v6  ;;  %v999_v47 = vrot.slane %v998_v29, 4  ;;  %v1005_v39 = vsel %vm427_vm0, %v2885_v7, 0.0 }
  0xda   : > { %v976_v58 = vadd.f32 %v975_v30, %v974_v61  ;;  %v982_v15 = vrot.slane %v981_v53, 1  ;;  %v988_v5 = vadd.f32 %v987_v10, %v986_v14  ;;  %v1006_v48 = vrot.slane %v1005_v39, 4 }
  0xdb   : > { %v2957_v60 = vpop.eup %2331  ;;  %v994_v38 = vrot.slane %v993_v33, 2  ;;  %v1000_v0 = vadd.f32 %v999_v47, %v998_v29  ;;  %v1012_v26 = vsel %vm427_vm0, %v2888_v40, 0.0  ;;  %v1019_v37 = vsel %vm427_vm0, %v2899_v49, 0.0 }
  0xdc   : > { %v983_v56 = vadd.f32 %v982_v15, %v981_v53  ;;  %v989_v57 = vrot.slane %v988_v5, 1  ;;  %2339 = vrcp.f32 %v976_v58  ;;  %v1007_v4 = vadd.f32 %v1006_v48, %v1005_v39 }
  0xdd   : > { %v2964_v7 = vpop.eup %2333  ;;  %v995_v8 = vadd.f32 %v994_v38, %v993_v33  ;;  %v1001_v42 = vrot.slane %v1000_v0, 2  ;;  %v1013_v27 = vrot.slane %v1012_v26, 4  ;;  %v1020_v23 = vrot.slane %v1019_v37, 4 }
  0xde   : > { %v2966_v6 = vpop.eup %2335  ;;  %v990_v61 = vadd.f32 %v989_v57, %v988_v5  ;;  %2341 = vrcp.f32 %v983_v56  ;;  %v1026_v40 = vsel %vm427_vm0, %v2901_v45, 0.0  ;;  %v1008_v29 = vrot.slane %v1007_v4, 2  ;;  %v839_v56 = vld.sshfl [vmem:[#allocation1] sm:$0xff pattern:$0x75316420] }
  0xdf   : > { %v2970_v49 = vpop.eup %2337  ;;  %v996_v22 = vrot.slane %v995_v8, 1  ;;  %v1002_v19 = vadd.f32 %v1001_v42, %v1000_v0  ;;  %v1014_v30 = vadd.f32 %v1013_v27, %v1012_v26  ;;  %v1021_v53 = vadd.f32 %v1020_v23, %v1019_v37  ;;  %v840_v0 = vld.sshfl [vmem:[#allocation1 + $0x8] sm:$0xff pattern:$0x75316420] }
  0xe0   : > { %2343 = vrcp.f32 %v990_v61  ;;  %v1027_v10 = vrot.slane %v1026_v40, 4  ;;  %v1009_v39 = vadd.f32 %v1008_v29, %v1007_v4  ;;  %v1033_v58 = vsel %vm427_vm0, %v2907_v25, 0.0 }
  0xe1   : > { %v997_v33 = vadd.f32 %v996_v22, %v995_v8  ;;  %v1003_v47 = vrot.slane %v1002_v19, 1  ;;  %v1015_v45 = vrot.slane %v1014_v30, 2  ;;  %v1022_v5 = vrot.slane %v1021_v53, 2 }
  0xe2   : > { %v2975_v15 = vpop.eup %2339  ;;  %v1028_v48 = vadd.f32 %v1027_v10, %v1026_v40  ;;  %v1034_v38 = vrot.slane %v1033_v58, 4  ;;  %v1010_v42 = vrot.slane %v1009_v39, 1  ;;  %v1040_v26 = vsel %vm427_vm0, %v2912_v62, 0.0 }
  0xe3   : > { %v1004_v57 = vadd.f32 %v1003_v47, %v1002_v19  ;;  %v1016_v8 = vadd.f32 %v1015_v45, %v1014_v30  ;;  %v1023_v4 = vadd.f32 %v1022_v5, %v1021_v53  ;;  %v1041_v23 = vrot.slane %v1040_v26, 4  ;;  %v841_v5 = vld.sshfl [vmem:[#allocation1 + $0x10] sm:$0xff pattern:$0x75316420] }
  0xe4   : > { %v2980_v37 = vpop.eup %2341  ;;  %v1029_v27 = vrot.slane %v1028_v48, 2  ;;  %v1035_v25 = vadd.f32 %v1034_v38, %v1033_v58  ;;  %v1011_v61 = vadd.f32 %v1010_v42, %v1009_v39  ;;  %2345 = vrcp.f32 %v997_v33  ;;  %v842_v38 = vld.sshfl [vmem:[#allocation1 + $0x18] sm:$0xff pattern:$0x75316420] }
  0xe5   : > { %v1047_v40 = vsel %vm427_vm0, %v839_v56, 0.0  ;;  %v1017_v29 = vrot.slane %v1016_v8, 1  ;;  %v1024_v10 = vrot.slane %v1023_v4, 1  ;;  %v1042_v14 = vadd.f32 %v1041_v23, %v1040_v26 }
  0xe6   : > { %v2983_v22 = vpop.eup %2343  ;;  %v1030_v19 = vadd.f32 %v1029_v27, %v1028_v48  ;;  %v1036_v47 = vrot.slane %v1035_v25, 2  ;;  %2347 = vrcp.f32 %v1004_v57  ;;  %v1048_v30 = vrot.slane %v1047_v40, 4  ;;  %v843_v27 = vld.sshfl [vmem:[#allocation1 + $0x20] sm:$0xff pattern:$0x75316420] }
  0xe7   : > { %v1018_v53 = vadd.f32 %v1017_v29, %v1016_v8  ;;  %v1025_v45 = vadd.f32 %v1024_v10, %v1023_v4  ;;  %v1043_v33 = vrot.slane %v1042_v14, 2  ;;  %2349 = vrcp.f32 %v1011_v61  ;;  %v845_v29 = vld.sshfl [vmem:[#allocation1 + $0x30] sm:$0xff pattern:$0x75316420] }
  0xe8   : > { %v1031_v58 = vrot.slane %v1030_v19, 1  ;;  %v1037_v39 = vadd.f32 %v1036_v47, %v1035_v25  ;;  %v1049_v56 = vadd.f32 %v1048_v30, %v1047_v40  ;;  %v1054_v42 = vsel %vm427_vm0, %v840_v0, 0.0  ;;  %v844_v25 = vld.sshfl [vmem:[#allocation1 + $0x28] sm:$0xff pattern:$0x75316420] }
  0xe9   : > { %2351 = vrcp.f32 %v1018_v53  ;;  %v1055_v12 = vrot.slane %v1054_v42, 4  ;;  %v1044_v57 = vadd.f32 %v1043_v33, %v1042_v14  ;;  %v1061_v8 = vsel %vm427_vm0, %v841_v5, 0.0  ;;  %v846_v33 = vld.sshfl [vmem:[#allocation1 + $0x38] sm:$0xff pattern:$0x75316420] }
  0xea   : > { %v1032_v34 = vadd.f32 %v1031_v58, %v1030_v19  ;;  %v1038_v48 = vrot.slane %v1037_v39, 1  ;;  %v2987_v62 = vpop.eup %2345  ;;  %2353 = vrcp.f32 %v1025_v45  ;;  %v1050_v26 = vrot.slane %v1049_v56, 2 }
  0xeb   : > { %v1056_v61 = vadd.f32 %v1055_v12, %v1054_v42  ;;  %v1062_v23 = vrot.slane %v1061_v8, 4  ;;  %v1045_v0 = vrot.slane %v1044_v57, 1  ;;  %v1068_v19 = vsel %vm427_vm0, %v842_v38, 0.0 }
  0xec   : > { %v1039_v4 = vadd.f32 %v1038_v48, %v1037_v39  ;;  %2355 = vrcp.f32 %v1032_v34  ;;  %v2990_v40 = vpop.eup %2347  ;;  %v1051_v10 = vadd.f32 %v1050_v26, %v1049_v56  ;;  %v1075_v47 = vsel %vm427_vm0, %v843_v27, 0.0 }
  0xed   : > { %v1057_v30 = vrot.slane %v1056_v61, 2  ;;  %v1063_v53 = vadd.f32 %v1062_v23, %v1061_v8  ;;  %v2998_v34 = vpop.eup %2349  ;;  %v1046_v12 = vadd.f32 %v1045_v0, %v1044_v57  ;;  %v1069_v58 = vrot.slane %v1068_v19, 4 }
  0xee   : > { %2357 = vrcp.f32 %v1039_v4  ;;  %v1052_v45 = vrot.slane %v1051_v10, 1  ;;  %v1076_v39 = vrot.slane %v1075_v47, 4  ;;  %v1082_v42 = vsel %vm427_vm0, %v844_v25, 0.0 }
  0xef   : > { %v3000_v5 = vpop.eup %2351  ;;  %v1058_v38 = vadd.f32 %v1057_v30, %v1056_v61  ;;  %v1064_v56 = vrot.slane %v1063_v53, 2  ;;  %v1089_v48 = vsel %vm427_vm0, %v845_v29, 0.0  ;;  %2359 = vrcp.f32 %v1046_v12 }
  0xf0   : > { %v3004_v27 = vpop.eup %2353  ;;  %v1053_v8 = vadd.f32 %v1052_v45, %v1051_v10  ;;  %v1070_v4 = vadd.f32 %v1069_v58, %v1068_v19  ;;  %v1077_v14 = vadd.f32 %v1076_v39, %v1075_v47  ;;  %v1083_v35 = vrot.slane %v1082_v42, 4 }
  0xf1   : > { %v1059_v23 = vrot.slane %v1058_v38, 1  ;;  %v1065_v0 = vadd.f32 %v1064_v56, %v1063_v53  ;;  %v1090_v25 = vrot.slane %v1089_v48, 4  ;;  %v1096_v29 = vsel %vm427_vm0, %v846_v33, 0.0 }
  0xf2   : > { %v3008_v57 = vpop.eup %2355  ;;  %v1071_v30 = vrot.slane %v1070_v4, 2  ;;  %v1078_v26 = vrot.slane %v1077_v14, 2  ;;  %v1084_v10 = vadd.f32 %v1083_v35, %v1082_v42  ;;  %v1097_v58 = vrot.slane %v1096_v29, 4  ;;  %v1231_v35 = vld [vmem:[%s3020_s7] sm:$0x77] }
  0xf3   : > { %v1060_v12 = vadd.f32 %v1059_v23, %v1058_v38  ;;  %v1066_v18 = vrot.slane %v1065_v0, 1  ;;  %v1091_v45 = vadd.f32 %v1090_v25, %v1089_v48  ;;  %2361 = vrcp.f32 %v1053_v8 }
  0xf4   : > { %v3012_v9 = vpop.eup %2357  ;;  %v1072_v19 = vadd.f32 %v1071_v30, %v1070_v4  ;;  %v1079_v53 = vadd.f32 %v1078_v26, %v1077_v14  ;;  %v1085_v47 = vrot.slane %v1084_v10, 2  ;;  %v1098_v13 = vadd.f32 %v1097_v58, %v1096_v29 }
  0xf5   : > { %v1067_v36 = vadd.f32 %v1066_v18, %v1065_v0  ;;  %2363 = vrcp.f32 %v1060_v12  ;;  %v3014_v39 = vpop.eup %2359  ;;  %v1092_v61 = vrot.slane %v1091_v45, 2  ;;  %v3391_v33 = vrot.slane %v2923_v55, 4  ;;  %v3024_v18 = vld [vmem:[%s3020_s7 + $0x80] sm:$0x77] }
  0xf6   : > { %v1073_v56 = vrot.slane %v1072_v19, 1  ;;  %v1080_v42 = vrot.slane %v1079_v53, 1  ;;  %v1086_v48 = vadd.f32 %v1085_v47, %v1084_v10  ;;  %v1099_v55 = vrot.slane %v1098_v13, 2  ;;  %v3038_v10 = vld [vmem:[%s3020_s7 + $0x180] sm:$0x77] }
  0xf7   : > { %v1183_v38 = vsel %vm427_vm0, %v2920_v16, %v3391_v33  ;;  %2365 = vrcp.f32 %v1067_v36  ;;  %v1093_v8 = vadd.f32 %v1092_v61, %v1091_v45  ;;  %v3031_v16 = vld [vmem:[%s3020_s7 + $0x100] sm:$0x77]  ;;  %v1247_v30 = vunpack.c.l.bf16 %v1231_v35 }
  0xf8   : > { %v1074_v26 = vadd.f32 %v1073_v56, %v1072_v19  ;;  %v3028_v4 = vmul.f32 %v2719_v63, %v1183_v38  ;;  %v1081_v23 = vadd.f32 %v1080_v42, %v1079_v53  ;;  %v1087_v0 = vrot.slane %v1086_v48, 1 }
  0xf9   : > { %v1440_v25 = vunpack.c.l.bf16 %v3024_v18  ;;  %v3034_v29 = vpop.eup %2361  ;;  %v1094_v12 = vrot.slane %v1093_v8, 1  ;;  %v1100_v58 = vadd.f32 %v1099_v55, %v1098_v13  ;;  %v1649_v45 = vunpack.c.l.bf16 %v3031_v16 }
  0xfa   : > { %3392 = vst [vmem:[#allocation10_spill] sm:$0xff] %v3034_v29  ;;  %2367 = vrcp.f32 %v1074_v26  ;;  %v1295_v36 = vperm.slane %v3028_v4, 0  ;;  %v1088_v63 = vadd.f32 %v1087_v0, %v1086_v48  ;;  %v1472_v19 = vperm.slane %v3028_v4, 1 }
  0xfb   : > { %v3040_v61 = vpop.eup %2363  ;;  %2369 = vrcp.f32 %v1081_v23  ;;  %v1095_v53 = vadd.f32 %v1094_v12, %v1093_v8  ;;  %v1101_v47 = vrot.slane %v1100_v58, 1  ;;  %v1681_v42 = vperm.slane %v3028_v4, 2 }
  0xfc   : > { %v1359_v33 = vperm.slane %v1295_v36, 0  ;;  %2371 = vrcp.f32 %v1088_v63  ;;  %v1536_v13 = vperm.slane %v1472_v19, 1  ;;  %v1858_v26 = vunpack.c.l.bf16 %v3038_v10 }
  0xfd   : > { %v3045_v38 = vpop.eup %2365  ;;  %v1102_v48 = vadd.f32 %v1101_v47, %v1100_v58  ;;  %2373 = vrcp.f32 %v1095_v53  ;;  %v1890_v23 = vperm.slane %v3028_v4, 3  ;;  %v1745_v8 = vperm.slane %v1681_v42, 2  ;;  %v1232_v42 = vld [vmem:[%s3020_s7 + $0x8] sm:$0x77] }
  0xfe   : > { %3393 = vst [vmem:[#allocation11_spill] sm:$0xff] %v3045_v38  ;;  %v1391_v55 = vmul.f32 %v1359_v33, %v1247_v30  ;;  %v1568_v0 = vmul.f32 %v1536_v13, %v1440_v25  ;;  %v1248_v12 = vunpack.c.h.bf16 %v1231_v35  ;;  %v1296_v56 = vperm.slane %v3028_v4, 4  ;;  %v2188_v38 = vld [vmem:[%s3020_s7 + $0x88] sm:$0x77] }
  0xff   : > { %2375 = vrcp.f32 %v1102_v48  ;;  %v1954_v63 = vperm.slane %v1890_v23, 3  ;;  %v1441_v19 = vunpack.c.h.bf16 %v3024_v18  ;;  %v1473_v14 = vperm.slane %v3028_v4, 5 }
 0x100   : > { %v3051_v36 = vpop.eup %2367  ;;  %v1600_v25 = vadd.f32 %v1568_v0, %v1391_v55  ;;  %v1777_v35 = vmul.f32 %v1745_v8, %v1649_v45  ;;  %v1360_v58 = vperm.slane %v1296_v56, 0  ;;  %v1650_v33 = vunpack.c.h.bf16 %v3031_v16  ;;  %v2204_v55 = vld [vmem:[%s3020_s7 + $0x108] sm:$0x77] }
 0x101   : > { %3394 = vst [vmem:[#allocation12_spill] sm:$0xff] %v3051_v36  ;;  %v3055_v46 = vpop.eup %2369  ;;  %v1986_v53 = vmul.f32 %v1954_v63, %v1858_v26  ;;  %v1537_v47 = vperm.slane %v1473_v14, 1  ;;  %v1682_v13 = vperm.slane %v3028_v4, 6  ;;  %v1891_v30 = vperm.slane %v3028_v4, 7  ;;  %v2220_v4 = vld [vmem:[%s3020_s7 + $0x188] sm:$0x77] }
 0x102   : > { %3395 = vst [vmem:[#allocation13_spill] sm:$0xff] %v3055_v46  ;;  %v3062_v18 = vpop.eup %2371  ;;  %v1809_v48 = vadd.f32 %v1777_v35, %v1600_v25  ;;  %v1392_v23 = vmul.f32 %v1360_v58, %v1248_v12  ;;  %v1859_v46 = vunpack.c.h.bf16 %v3038_v10  ;;  %v3398_v26 = vrot.slane %v2930_v3, 4 }
 0x103   : > { %3396 = vst [vmem:[#allocation14_spill] sm:$0xff] %v3062_v18  ;;  %v3068_v45 = vpop.eup %2373  ;;  %v1569_v16 = vmul.f32 %v1537_v47, %v1441_v19  ;;  %v1746_v56 = vperm.slane %v1682_v13, 2  ;;  %v1955_v12 = vperm.slane %v1891_v30, 3  ;;  %v1249_v63 = vunpack.c.l.bf16 %v1232_v42 }
 0x104   : > { %3397 = vst [vmem:[#allocation15_spill] sm:$0xff] %v3068_v45  ;;  %v1184_v0 = vsel %vm427_vm0, %v2927_v52, %v3398_v26  ;;  %v2018_v8 = vadd.f32 %v1986_v53, %v1809_v48  ;;  %v1442_v45 = vunpack.c.l.bf16 %v2188_v38  ;;  %v1651_v36 = vunpack.c.l.bf16 %v2204_v55 }
 0x105   : > { %v1216_v10 = vmul.f32 %v2725_v11, %v1184_v0  ;;  %v3077_v25 = vpop.eup %2375  ;;  %v1601_v35 = vadd.f32 %v1569_v16, %v1392_v23  ;;  %v1778_v58 = vmul.f32 %v1746_v56, %v1650_v33  ;;  %v1987_v52 = vmul.f32 %v1955_v12, %v1859_v46 }
 0x106   : > { %3399 = vst [vmem:[#allocation16_spill] sm:$0xff] %v3077_v25  ;;  %v1860_v47 = vunpack.c.l.bf16 %v2220_v4  ;;  %v1250_v23 = vunpack.c.h.bf16 %v1232_v42  ;;  %v1443_v19 = vunpack.c.h.bf16 %v2188_v38  ;;  %v1652_v18 = vunpack.c.h.bf16 %v2204_v55 }
 0x107   : > { %2050 = vst [vmem:[%s3082_s14] sm:$0x1f] %v2018_v8  ;;  %v1297_v3 = vperm.slane %v1216_v10, 0  ;;  %v1474_v30 = vperm.slane %v1216_v10, 1  ;;  %v1810_v53 = vadd.f32 %v1778_v58, %v1601_v35  ;;  %v1683_v11 = vperm.slane %v1216_v10, 2  ;;  %v1233_v58 = vld [vmem:[%s3020_s7 + $0x10] sm:$0x77] }
 0x108   : > { %v1892_v13 = vperm.slane %v1216_v10, 3  ;;  %v1298_v16 = vperm.slane %v1216_v10, 4  ;;  %v1475_v35 = vperm.slane %v1216_v10, 5 }
 0x109   : > { %v1361_v48 = vperm.slane %v1297_v3, 0  ;;  %v1538_v33 = vperm.slane %v1474_v30, 1  ;;  %v2019_v56 = vadd.f32 %v1987_v52, %v1810_v53  ;;  %v1747_v26 = vperm.slane %v1683_v11, 2  ;;  %v2189_v30 = vld [vmem:[%s3020_s7 + $0x90] sm:$0x77] }
 0x10a   : > { %v1956_v0 = vperm.slane %v1892_v13, 3  ;;  %v1362_v12 = vperm.slane %v1298_v16, 0  ;;  %v1684_v3 = vperm.slane %v1216_v10, 6  ;;  %v1539_v29 = vperm.slane %v1475_v35, 1  ;;  %v2205_v53 = vld [vmem:[%s3020_s7 + $0x110] sm:$0x77] }
 0x10b   : > { %v1393_v8 = vmul.f32 %v1361_v48, %v1249_v63  ;;  %v1570_v46 = vmul.f32 %v1538_v33, %v1442_v45  ;;  %2051 = vst [vmem:[%s3082_s14 + $0x8] sm:$0x1f] %v2019_v56  ;;  %v1779_v14 = vmul.f32 %v1747_v26, %v1651_v36  ;;  %v1861_v52 = vunpack.c.h.bf16 %v2220_v4  ;;  %v3090_v11 = vld [vmem:[%s3020_s7 + $0x190] sm:$0x77] }
 0x10c   : > { %v1988_v25 = vmul.f32 %v1956_v0, %v1860_v47  ;;  %v1394_v43 = vmul.f32 %v1362_v12, %v1250_v23  ;;  %v1748_v38 = vperm.slane %v1684_v3, 2  ;;  %v1893_v63 = vperm.slane %v1216_v10, 7 }
 0x10d   : > { %v1602_v42 = vadd.f32 %v1570_v46, %v1393_v8  ;;  %v3400_v45 = vrot.slane %v2937_v41, 4  ;;  %v1251_v48 = vunpack.c.l.bf16 %v1233_v58  ;;  %v1571_v55 = vmul.f32 %v1539_v29, %v1443_v19 }
 0x10e   : > { %v1444_v33 = vunpack.c.l.bf16 %v2189_v30  ;;  %v1780_v23 = vmul.f32 %v1748_v38, %v1652_v18  ;;  %v1957_v16 = vperm.slane %v1893_v63, 3  ;;  %v1653_v4 = vunpack.c.l.bf16 %v2205_v53  ;;  %v1234_v63 = vld [vmem:[%s3020_s7 + $0x18] sm:$0x77] }
 0x10f   : > { %v1185_v13 = vsel %vm427_vm0, %v2932_v50, %v3400_v45  ;;  %v1811_v36 = vadd.f32 %v1779_v14, %v1602_v42  ;;  %v1862_v56 = vunpack.c.l.bf16 %v3090_v11  ;;  %v1603_v0 = vadd.f32 %v1571_v55, %v1394_v43  ;;  %v2190_v55 = vld [vmem:[%s3020_s7 + $0x98] sm:$0x77] }
 0x110   : > { %v1217_v47 = vmul.f32 %v2728_v24, %v1185_v13  ;;  %v1989_v41 = vmul.f32 %v1957_v16, %v1861_v52  ;;  %v1252_v12 = vunpack.c.h.bf16 %v1233_v58  ;;  %v1445_v3 = vunpack.c.h.bf16 %v2189_v30 }
 0x111   : > { %v2020_v26 = vadd.f32 %v1988_v25, %v1811_v36  ;;  %v1812_v14 = vadd.f32 %v1780_v23, %v1603_v0  ;;  %v1654_v36 = vunpack.c.h.bf16 %v2205_v53  ;;  %v3102_v23 = vld [vmem:[%s3020_s7 + $0x118] sm:$0x77]  ;;  %v1863_v30 = vunpack.c.h.bf16 %v3090_v11 }
 0x112   : > { %v1299_v10 = vperm.slane %v1217_v47, 0  ;;  %v1476_v8 = vperm.slane %v1217_v47, 1  ;;  %v1685_v46 = vperm.slane %v1217_v47, 2  ;;  %v1894_v50 = vperm.slane %v1217_v47, 3 }
 0x113   : > { %2052 = vst [vmem:[%s3082_s14 + $0x10] sm:$0x1f] %v2020_v26  ;;  %v1300_v18 = vperm.slane %v1217_v47, 4  ;;  %v1477_v25 = vperm.slane %v1217_v47, 5  ;;  %v2021_v43 = vadd.f32 %v1989_v41, %v1812_v14  ;;  %v1686_v0 = vperm.slane %v1217_v47, 6 }
 0x114   : > { %v1363_v29 = vperm.slane %v1299_v10, 0  ;;  %v1540_v24 = vperm.slane %v1476_v8, 1  ;;  %v1749_v19 = vperm.slane %v1685_v46, 2  ;;  %v1958_v35 = vperm.slane %v1894_v50, 3  ;;  %v3107_v10 = vld [vmem:[%s3020_s7 + $0x198] sm:$0x77] }
 0x115   : > { %v1364_v38 = vperm.slane %v1300_v18, 0  ;;  %v1541_v13 = vperm.slane %v1477_v25, 1  ;;  %2053 = vst [vmem:[%s3082_s14 + $0x18] sm:$0x1f] %v2021_v43  ;;  %v1750_v41 = vperm.slane %v1686_v0, 2  ;;  %v1446_v50 = vunpack.c.l.bf16 %v2190_v55 }
 0x116   : > { %v1395_v42 = vmul.f32 %v1363_v29, %v1251_v48  ;;  %v1572_v52 = vmul.f32 %v1540_v24, %v1444_v33  ;;  %v1781_v45 = vmul.f32 %v1749_v19, %v1653_v4  ;;  %v1990_v58 = vmul.f32 %v1958_v35, %v1862_v56  ;;  %v1235_v0 = vld [vmem:[%s3020_s7 + $0x20] sm:$0x77] }
 0x117   : > { %v1396_v26 = vmul.f32 %v1364_v38, %v1252_v12  ;;  %v1573_v8 = vmul.f32 %v1541_v13, %v1445_v3  ;;  %v1895_v48 = vperm.slane %v1217_v47, 7  ;;  %v3401_v33 = vrot.slane %v2946_v59, 4 }
 0x118   : > { %v1604_v16 = vadd.f32 %v1572_v52, %v1395_v42  ;;  %v1253_v56 = vunpack.c.l.bf16 %v1234_v63  ;;  %v1655_v11 = vunpack.c.l.bf16 %v3102_v23  ;;  %v1864_v29 = vunpack.c.l.bf16 %v3107_v10 }
 0x119   : > { %v1186_v4 = vsel %vm427_vm0, %v2942_v2, %v3401_v33  ;;  %v1605_v12 = vadd.f32 %v1573_v8, %v1396_v26  ;;  %v1959_v14 = vperm.slane %v1895_v48, 3  ;;  %v1782_v47 = vmul.f32 %v1750_v41, %v1654_v36  ;;  %v2191_v33 = vld [vmem:[%s3020_s7 + $0xa0] sm:$0x77] }
 0x11a   : > { %v1813_v53 = vadd.f32 %v1781_v45, %v1604_v16  ;;  %v1218_v46 = vmul.f32 %v2737_v1, %v1186_v4  ;;  %v1254_v3 = vunpack.c.h.bf16 %v1234_v63  ;;  %v1447_v45 = vunpack.c.h.bf16 %v2190_v55  ;;  %v3121_v4 = vld [vmem:[%s3020_s7 + $0x120] sm:$0x77] }
 0x11b   : > { %v1991_v19 = vmul.f32 %v1959_v14, %v1863_v30  ;;  %v1814_v25 = vadd.f32 %v1782_v47, %v1605_v12  ;;  %v1656_v48 = vunpack.c.h.bf16 %v3102_v23  ;;  %v1865_v55 = vunpack.c.h.bf16 %v3107_v10  ;;  %v3126_v14 = vld [vmem:[%s3020_s7 + $0x1a0] sm:$0x77] }
 0x11c   : > { %v2022_v24 = vadd.f32 %v1990_v58, %v1813_v53  ;;  %v1301_v18 = vperm.slane %v1218_v46, 0  ;;  %v1478_v59 = vperm.slane %v1218_v46, 1  ;;  %v1687_v35 = vperm.slane %v1218_v46, 2 }
 0x11d   : > { %v1896_v2 = vperm.slane %v1218_v46, 3  ;;  %v1302_v42 = vperm.slane %v1218_v46, 4  ;;  %v1479_v58 = vperm.slane %v1218_v46, 5  ;;  %v2023_v13 = vadd.f32 %v1991_v19, %v1814_v25 }
 0x11e   : > { %2054 = vst [vmem:[%s3082_s14 + $0x20] sm:$0x1f] %v2022_v24  ;;  %v1365_v43 = vperm.slane %v1301_v18, 0  ;;  %v1542_v1 = vperm.slane %v1478_v59, 1  ;;  %v1751_v52 = vperm.slane %v1687_v35, 2  ;;  %v1688_v12 = vperm.slane %v1218_v46, 6 }
 0x11f   : > { %v1960_v38 = vperm.slane %v1896_v2, 3  ;;  %v1366_v26 = vperm.slane %v1302_v42, 0  ;;  %v1543_v8 = vperm.slane %v1479_v58, 1  ;;  %2055 = vst [vmem:[%s3082_s14 + $0x28] sm:$0x1f] %v2023_v13  ;;  %v3402_v24 = vrot.slane %v2957_v60, 4 }
 0x120   : > { %v1397_v36 = vmul.f32 %v1365_v43, %v1253_v56  ;;  %v1574_v16 = vmul.f32 %v1542_v1, %v1446_v50  ;;  %v1783_v30 = vmul.f32 %v1751_v52, %v1655_v11  ;;  %v1897_v50 = vperm.slane %v1218_v46, 7 }
 0x121   : > { %v1992_v63 = vmul.f32 %v1960_v38, %v1864_v29  ;;  %v1398_v41 = vmul.f32 %v1366_v26, %v1254_v3  ;;  %v1575_v56 = vmul.f32 %v1543_v8, %v1447_v45  ;;  %v1187_v11 = vsel %vm427_vm0, %v2953_v32, %v3402_v24 }
 0x122   : > { %v1606_v53 = vadd.f32 %v1574_v16, %v1397_v36  ;;  %v1255_v29 = vunpack.c.l.bf16 %v1235_v0  ;;  %v1752_v47 = vperm.slane %v1688_v12, 2  ;;  %v1219_v18 = vmul.f32 %v2761_v31, %v1187_v11 }
 0x123   : > { %v1448_v59 = vunpack.c.l.bf16 %v2191_v33  ;;  %v1607_v19 = vadd.f32 %v1575_v56, %v1398_v41  ;;  %v1961_v35 = vperm.slane %v1897_v50, 3  ;;  %v1657_v10 = vunpack.c.l.bf16 %v3121_v4  ;;  %v3140_v56 = vld [vmem:[%s3020_s7 + $0x128] sm:$0x77] }
 0x124   : > { %v1815_v23 = vadd.f32 %v1783_v30, %v1606_v53  ;;  %v1866_v2 = vunpack.c.l.bf16 %v3126_v14  ;;  %v1784_v46 = vmul.f32 %v1752_v47, %v1656_v48  ;;  %v1303_v25 = vperm.slane %v1219_v18, 0  ;;  %v1236_v48 = vld [vmem:[%s3020_s7 + $0x28] sm:$0x77] }
 0x125   : > { %v1480_v60 = vperm.slane %v1219_v18, 1  ;;  %v1993_v43 = vmul.f32 %v1961_v35, %v1865_v55  ;;  %v1689_v1 = vperm.slane %v1219_v18, 2  ;;  %v1898_v32 = vperm.slane %v1219_v18, 3  ;;  %v2192_v55 = vld [vmem:[%s3020_s7 + $0xa8] sm:$0x77] }
 0x126   : > { %v2024_v3 = vadd.f32 %v1992_v63, %v1815_v23  ;;  %v1256_v42 = vunpack.c.h.bf16 %v1235_v0  ;;  %v1816_v52 = vadd.f32 %v1784_v46, %v1607_v19  ;;  %v1367_v38 = vperm.slane %v1303_v25, 0  ;;  %v3145_v23 = vld [vmem:[%s3020_s7 + $0x1a8] sm:$0x77] }
 0x127   : > { %v1544_v31 = vperm.slane %v1480_v60, 1  ;;  %v1304_v45 = vperm.slane %v1219_v18, 4  ;;  %v1753_v58 = vperm.slane %v1689_v1, 2  ;;  %v1962_v13 = vperm.slane %v1898_v32, 3 }
 0x128   : > { %2056 = vst [vmem:[%s3082_s14 + $0x30] sm:$0x1f] %v2024_v3  ;;  %v1449_v36 = vunpack.c.h.bf16 %v2191_v33  ;;  %v1481_v16 = vperm.slane %v1219_v18, 5  ;;  %v2025_v26 = vadd.f32 %v1993_v43, %v1816_v52  ;;  %v1399_v30 = vmul.f32 %v1367_v38, %v1255_v29 }
 0x129   : > { %v1576_v63 = vmul.f32 %v1544_v31, %v1448_v59  ;;  %v1368_v8 = vperm.slane %v1304_v45, 0  ;;  %v1785_v53 = vmul.f32 %v1753_v58, %v1657_v10  ;;  %v1994_v0 = vmul.f32 %v1962_v13, %v1866_v2 }
 0x12a   : > { %v1545_v41 = vperm.slane %v1481_v16, 1  ;;  %v1658_v12 = vunpack.c.h.bf16 %v3121_v4  ;;  %2057 = vst [vmem:[%s3082_s14 + $0x38] sm:$0x1f] %v2025_v26  ;;  %v1690_v11 = vperm.slane %v1219_v18, 6  ;;  %v1867_v33 = vunpack.c.h.bf16 %v3126_v14 }
 0x12b   : > { %v1608_v50 = vadd.f32 %v1576_v63, %v1399_v30  ;;  %v1400_v24 = vmul.f32 %v1368_v8, %v1256_v42  ;;  %v1899_v47 = vperm.slane %v1219_v18, 7  ;;  %v3403_v59 = vrot.slane %v2966_v6, 4 }
 0x12c   : > { %v1577_v29 = vmul.f32 %v1545_v41, %v1449_v36  ;;  %v1257_v35 = vunpack.c.l.bf16 %v1236_v48  ;;  %v1754_v10 = vperm.slane %v1690_v11, 2  ;;  %v1450_v3 = vunpack.c.l.bf16 %v2192_v55 }
 0x12d   : > { %v1188_v19 = vsel %vm427_vm0, %v2964_v7, %v3403_v59  ;;  %v1817_v4 = vadd.f32 %v1785_v53, %v1608_v50  ;;  %v1963_v25 = vperm.slane %v1899_v47, 3  ;;  %v1659_v14 = vunpack.c.l.bf16 %v3140_v56  ;;  %v1237_v53 = vld [vmem:[%s3020_s7 + $0x30] sm:$0x77] }
 0x12e   : > { %v1220_v2 = vmul.f32 %v2772_v54, %v1188_v19  ;;  %v1609_v46 = vadd.f32 %v1577_v29, %v1400_v24  ;;  %v1868_v60 = vunpack.c.l.bf16 %v3145_v23  ;;  %v1786_v18 = vmul.f32 %v1754_v10, %v1658_v12  ;;  %v2193_v50 = vld [vmem:[%s3020_s7 + $0xb0] sm:$0x77] }
 0x12f   : > { %v2026_v43 = vadd.f32 %v1994_v0, %v1817_v4  ;;  %v1995_v32 = vmul.f32 %v1963_v25, %v1867_v33  ;;  %v1258_v52 = vunpack.c.h.bf16 %v1236_v48  ;;  %v1451_v36 = vunpack.c.h.bf16 %v2192_v55  ;;  %v3159_v24 = vld [vmem:[%s3020_s7 + $0x130] sm:$0x77] }
 0x130   : > { %v1305_v1 = vperm.slane %v1220_v2, 0  ;;  %v1482_v6 = vperm.slane %v1220_v2, 1  ;;  %v1691_v42 = vperm.slane %v1220_v2, 2  ;;  %v1900_v7 = vperm.slane %v1220_v2, 3  ;;  %v3164_v47 = vld [vmem:[%s3020_s7 + $0x1b0] sm:$0x77] }
 0x131   : > { %2058 = vst [vmem:[%s3082_s14 + $0x40] sm:$0x1f] %v2026_v43  ;;  %v1818_v38 = vadd.f32 %v1786_v18, %v1609_v46  ;;  %v1306_v45 = vperm.slane %v1220_v2, 4  ;;  %v1483_v16 = vperm.slane %v1220_v2, 5  ;;  %v1660_v12 = vunpack.c.h.bf16 %v3140_v56 }
 0x132   : > { %v1369_v31 = vperm.slane %v1305_v1, 0  ;;  %v1546_v54 = vperm.slane %v1482_v6, 1  ;;  %v1755_v58 = vperm.slane %v1691_v42, 2  ;;  %v1964_v13 = vperm.slane %v1900_v7, 3 }
 0x133   : > { %v2027_v26 = vadd.f32 %v1995_v32, %v1818_v38  ;;  %v1370_v8 = vperm.slane %v1306_v45, 0  ;;  %v1547_v41 = vperm.slane %v1483_v16, 1  ;;  %v1692_v29 = vperm.slane %v1220_v2, 6 }
 0x134   : > { %v1401_v30 = vmul.f32 %v1369_v31, %v1257_v35  ;;  %v1578_v63 = vmul.f32 %v1546_v54, %v1450_v3  ;;  %v1787_v0 = vmul.f32 %v1755_v58, %v1659_v14  ;;  %v1996_v48 = vmul.f32 %v1964_v13, %v1868_v60 }
 0x135   : > { %2059 = vst [vmem:[%s3082_s14 + $0x48] sm:$0x1f] %v2027_v26  ;;  %v1402_v33 = vmul.f32 %v1370_v8, %v1258_v52  ;;  %v1869_v55 = vunpack.c.h.bf16 %v3145_v23  ;;  %v1579_v59 = vmul.f32 %v1547_v41, %v1451_v36  ;;  %v1901_v19 = vperm.slane %v1220_v2, 7  ;;  %v3178_v41 = vld [vmem:[%s3020_s7 + $0x138] sm:$0x77] }
 0x136   : > { %v1610_v11 = vadd.f32 %v1578_v63, %v1401_v30  ;;  %v3404_v35 = vrot.slane %v2975_v15, 4  ;;  %v1259_v10 = vunpack.c.l.bf16 %v1237_v53  ;;  %v1756_v3 = vperm.slane %v1692_v29, 2  ;;  %v1238_v30 = vld [vmem:[%s3020_s7 + $0x38] sm:$0x77] }
 0x137   : > { %v1452_v25 = vunpack.c.l.bf16 %v2193_v50  ;;  %v1611_v14 = vadd.f32 %v1579_v59, %v1402_v33  ;;  %v1965_v60 = vperm.slane %v1901_v19, 3  ;;  %v1661_v23 = vunpack.c.l.bf16 %v3159_v24  ;;  %v3183_v29 = vld [vmem:[%s3020_s7 + $0x1b8] sm:$0x77] }
 0x138   : > { %v1189_v4 = vsel %vm427_vm0, %v2970_v49, %v3404_v35  ;;  %v1819_v56 = vadd.f32 %v1787_v0, %v1610_v11  ;;  %v1870_v43 = vunpack.c.l.bf16 %v3164_v47  ;;  %v1788_v2 = vmul.f32 %v1756_v3, %v1660_v12 }
 0x139   : > { %v1221_v46 = vmul.f32 %v2787_v20, %v1189_v4  ;;  %v1997_v6 = vmul.f32 %v1965_v60, %v1869_v55  ;;  %v1260_v42 = vunpack.c.h.bf16 %v1237_v53  ;;  %v1453_v45 = vunpack.c.h.bf16 %v2193_v50 }
 0x13a   : > { %v2028_v18 = vadd.f32 %v1996_v48, %v1819_v56  ;;  %v1820_v7 = vadd.f32 %v1788_v2, %v1611_v14  ;;  %v1662_v0 = vunpack.c.h.bf16 %v3159_v24  ;;  %v2194_v48 = vld [vmem:[%s3020_s7 + $0xb8] sm:$0x77]  ;;  %v1871_v50 = vunpack.c.h.bf16 %v3164_v47 }
 0x13b   : > { %v1307_v1 = vperm.slane %v1221_v46, 0  ;;  %v1484_v15 = vperm.slane %v1221_v46, 1  ;;  %v1693_v32 = vperm.slane %v1221_v46, 2  ;;  %v1902_v49 = vperm.slane %v1221_v46, 3 }
 0x13c   : > { %2060 = vst [vmem:[%s3082_s14 + $0x50] sm:$0x1f] %v2028_v18  ;;  %v1308_v38 = vperm.slane %v1221_v46, 4  ;;  %v1485_v58 = vperm.slane %v1221_v46, 5  ;;  %v2029_v13 = vadd.f32 %v1997_v6, %v1820_v7  ;;  %v1694_v33 = vperm.slane %v1221_v46, 6 }
 0x13d   : > { %v1371_v52 = vperm.slane %v1307_v1, 0  ;;  %v1548_v20 = vperm.slane %v1484_v15, 1  ;;  %v1757_v31 = vperm.slane %v1693_v32, 2  ;;  %v1966_v54 = vperm.slane %v1902_v49, 3 }
 0x13e   : > { %v1372_v26 = vperm.slane %v1308_v38, 0  ;;  %v1549_v53 = vperm.slane %v1485_v58, 1  ;;  %2061 = vst [vmem:[%s3082_s14 + $0x58] sm:$0x1f] %v2029_v13  ;;  %v1903_v59 = vperm.slane %v1221_v46, 7  ;;  %v3405_v19 = vrot.slane %v2983_v22, 4 }
 0x13f   : > { %v1403_v36 = vmul.f32 %v1371_v52, %v1259_v10  ;;  %v1580_v16 = vmul.f32 %v1548_v20, %v1452_v25  ;;  %v1789_v63 = vmul.f32 %v1757_v31, %v1661_v23  ;;  %v1998_v8 = vmul.f32 %v1966_v54, %v1870_v43 }
 0x140   : > { %v1404_v11 = vmul.f32 %v1372_v26, %v1260_v42  ;;  %v1581_v55 = vmul.f32 %v1549_v53, %v1453_v45  ;;  %v1190_v35 = vsel %vm427_vm0, %v2980_v37, %v3405_v19  ;;  %v1261_v4 = vunpack.c.l.bf16 %v1238_v30  ;;  %v1239_v45 = vld [vmem:[%s3020_s7 + $0x40] sm:$0x77] }
 0x141   : > { %v1612_v12 = vadd.f32 %v1580_v16, %v1403_v36  ;;  %v1758_v10 = vperm.slane %v1694_v33, 2  ;;  %v1222_v56 = vmul.f32 %v2797_v28, %v1190_v35  ;;  %v1454_v3 = vunpack.c.l.bf16 %v2194_v48  ;;  %v2195_v26 = vld [vmem:[%s3020_s7 + $0xc0] sm:$0x77] }
 0x142   : > { %v1613_v25 = vadd.f32 %v1581_v55, %v1404_v11  ;;  %v1967_v14 = vperm.slane %v1903_v59, 3  ;;  %v1663_v47 = vunpack.c.l.bf16 %v3178_v41  ;;  %v1872_v60 = vunpack.c.l.bf16 %v3183_v29 }
 0x143   : > { %v1821_v24 = vadd.f32 %v1789_v63, %v1612_v12  ;;  %v1790_v46 = vmul.f32 %v1758_v10, %v1662_v0  ;;  %v1309_v43 = vperm.slane %v1222_v56, 0  ;;  %v1486_v22 = vperm.slane %v1222_v56, 1 }
 0x144   : > { %v1999_v18 = vmul.f32 %v1967_v14, %v1871_v50  ;;  %v1695_v2 = vperm.slane %v1222_v56, 2  ;;  %v1904_v37 = vperm.slane %v1222_v56, 3  ;;  %v1262_v1 = vunpack.c.h.bf16 %v1238_v30  ;;  %v3197_v30 = vld [vmem:[%s3020_s7 + $0x140] sm:$0x77] }
 0x145   : > { %v2030_v23 = vadd.f32 %v1998_v8, %v1821_v24  ;;  %v1822_v15 = vadd.f32 %v1790_v46, %v1613_v25  ;;  %v1373_v6 = vperm.slane %v1309_v43, 0  ;;  %v1550_v28 = vperm.slane %v1486_v22, 1 }
 0x146   : > { %v1310_v32 = vperm.slane %v1222_v56, 4  ;;  %v1759_v49 = vperm.slane %v1695_v2, 2  ;;  %v1968_v42 = vperm.slane %v1904_v37, 3  ;;  %v1455_v7 = vunpack.c.h.bf16 %v2194_v48  ;;  %v3202_v48 = vld [vmem:[%s3020_s7 + $0x1c0] sm:$0x77] }
 0x147   : > { %2062 = vst [vmem:[%s3082_s14 + $0x60] sm:$0x1f] %v2030_v23  ;;  %v1487_v52 = vperm.slane %v1222_v56, 5  ;;  %v2031_v20 = vadd.f32 %v1999_v18, %v1822_v15  ;;  %v1405_v38 = vmul.f32 %v1373_v6, %v1261_v4  ;;  %v1582_v31 = vmul.f32 %v1550_v28, %v1454_v3 }
 0x148   : > { %v1374_v54 = vperm.slane %v1310_v32, 0  ;;  %v1791_v58 = vmul.f32 %v1759_v49, %v1663_v47  ;;  %v2000_v13 = vmul.f32 %v1968_v42, %v1872_v60  ;;  %v1664_v16 = vunpack.c.h.bf16 %v3178_v41  ;;  %v1240_v32 = vld [vmem:[%s3020_s7 + $0x48] sm:$0x77] }
 0x149   : > { %v1551_v36 = vperm.slane %v1487_v52, 1  ;;  %2063 = vst [vmem:[%s3082_s14 + $0x68] sm:$0x1f] %v2031_v20  ;;  %v1614_v63 = vadd.f32 %v1582_v31, %v1405_v38  ;;  %v1696_v53 = vperm.slane %v1222_v56, 6  ;;  %v1873_v0 = vunpack.c.h.bf16 %v3183_v29  ;;  %v2196_v20 = vld [vmem:[%s3020_s7 + $0xc8] sm:$0x77] }
 0x14a   : > { %v1406_v8 = vmul.f32 %v1374_v54, %v1262_v1  ;;  %v1905_v11 = vperm.slane %v1222_v56, 7  ;;  %v3406_v33 = vrot.slane %v2990_v40, 4  ;;  %v1263_v55 = vunpack.c.l.bf16 %v1239_v45  ;;  %v3216_v38 = vld [vmem:[%s3020_s7 + $0x148] sm:$0x77] }
 0x14b   : > { %v1583_v12 = vmul.f32 %v1551_v36, %v1455_v7  ;;  %v1823_v41 = vadd.f32 %v1791_v58, %v1614_v63  ;;  %v1760_v59 = vperm.slane %v1696_v53, 2  ;;  %v1456_v35 = vunpack.c.l.bf16 %v2195_v26 }
 0x14c   : > { %v1191_v50 = vsel %vm427_vm0, %v2987_v62, %v3406_v33  ;;  %v1969_v24 = vperm.slane %v1905_v11, 3  ;;  %v1665_v29 = vunpack.c.l.bf16 %v3197_v30  ;;  %v1874_v10 = vunpack.c.l.bf16 %v3202_v48 }
 0x14d   : > { %v1223_v19 = vmul.f32 %v2822_v21, %v1191_v50  ;;  %v1615_v4 = vadd.f32 %v1583_v12, %v1406_v8  ;;  %v2032_v3 = vadd.f32 %v2000_v13, %v1823_v41  ;;  %v1792_v56 = vmul.f32 %v1760_v59, %v1664_v16  ;;  %v3221_v13 = vld [vmem:[%s3020_s7 + $0x1c8] sm:$0x77] }
 0x14e   : > { %v2001_v14 = vmul.f32 %v1969_v24, %v1873_v0  ;;  %v1264_v60 = vunpack.c.h.bf16 %v1239_v45  ;;  %v1457_v2 = vunpack.c.h.bf16 %v2195_v26  ;;  %v1666_v52 = vunpack.c.h.bf16 %v3197_v30 }
 0x14f   : > { %v1311_v25 = vperm.slane %v1223_v19, 0  ;;  %v1488_v40 = vperm.slane %v1223_v19, 1  ;;  %v1697_v47 = vperm.slane %v1223_v19, 2  ;;  %v1906_v62 = vperm.slane %v1223_v19, 3  ;;  %2064 = vst [vmem:[%s3082_s14 + $0x70] sm:$0x1f] %v2032_v3 }
 0x150   : > { %v1824_v23 = vadd.f32 %v1792_v56, %v1615_v4  ;;  %v1312_v43 = vperm.slane %v1223_v19, 4  ;;  %v1489_v37 = vperm.slane %v1223_v19, 5  ;;  %v1698_v45 = vperm.slane %v1223_v19, 6 }
 0x151   : > { %v1375_v46 = vperm.slane %v1311_v25, 0  ;;  %v1552_v21 = vperm.slane %v1488_v40, 1  ;;  %v1761_v22 = vperm.slane %v1697_v47, 2  ;;  %v1970_v18 = vperm.slane %v1906_v62, 3 }
 0x152   : > { %v2033_v1 = vadd.f32 %v2001_v14, %v1824_v23  ;;  %v1376_v28 = vperm.slane %v1312_v43, 0  ;;  %v1553_v7 = vperm.slane %v1489_v37, 1  ;;  %v1875_v58 = vunpack.c.h.bf16 %v3202_v48  ;;  %v1241_v23 = vld [vmem:[%s3020_s7 + $0x50] sm:$0x77] }
 0x153   : > { %v1407_v15 = vmul.f32 %v1375_v46, %v1263_v55  ;;  %v1584_v6 = vmul.f32 %v1552_v21, %v1456_v35  ;;  %v1793_v49 = vmul.f32 %v1761_v22, %v1665_v29  ;;  %v2002_v42 = vmul.f32 %v1970_v18, %v1874_v10  ;;  %v2197_v18 = vld [vmem:[%s3020_s7 + $0xd0] sm:$0x77] }
 0x154   : > { %2065 = vst [vmem:[%s3082_s14 + $0x78] sm:$0x1f] %v2033_v1  ;;  %v1408_v54 = vmul.f32 %v1376_v28, %v1264_v60  ;;  %v1585_v36 = vmul.f32 %v1553_v7, %v1457_v2  ;;  %v1907_v16 = vperm.slane %v1223_v19, 7  ;;  %v3407_v26 = vrot.slane %v3000_v5, 4  ;;  %v3235_v2 = vld [vmem:[%s3020_s7 + $0x150] sm:$0x77] }
 0x155   : > { %v1616_v31 = vadd.f32 %v1584_v6, %v1407_v15  ;;  %v1265_v8 = vunpack.c.l.bf16 %v1240_v32  ;;  %v1762_v53 = vperm.slane %v1698_v45, 2  ;;  %v1458_v12 = vunpack.c.l.bf16 %v2196_v20  ;;  %v3240_v28 = vld [vmem:[%s3020_s7 + $0x1d0] sm:$0x77] }
 0x156   : > { %v1192_v63 = vsel %vm427_vm0, %v2998_v34, %v3407_v26  ;;  %v1617_v11 = vadd.f32 %v1585_v36, %v1408_v54  ;;  %v1971_v33 = vperm.slane %v1907_v16, 3  ;;  %v1667_v48 = vunpack.c.l.bf16 %v3216_v38 }
 0x157   : > { %v1825_v30 = vadd.f32 %v1793_v49, %v1616_v31  ;;  %v1224_v0 = vmul.f32 %v2836_v44, %v1192_v63  ;;  %v1876_v50 = vunpack.c.l.bf16 %v3221_v13  ;;  %v1794_v41 = vmul.f32 %v1762_v53, %v1666_v52 }
 0x158   : > { %v2003_v19 = vmul.f32 %v1971_v33, %v1875_v58  ;;  %v1266_v4 = vunpack.c.h.bf16 %v1240_v32  ;;  %v1459_v25 = vunpack.c.h.bf16 %v2196_v20  ;;  %v1668_v22 = vunpack.c.h.bf16 %v3216_v38 }
 0x159   : > { %v2034_v55 = vadd.f32 %v2002_v42, %v1825_v30  ;;  %v1313_v59 = vperm.slane %v1224_v0, 0  ;;  %v1490_v5 = vperm.slane %v1224_v0, 1  ;;  %v1699_v35 = vperm.slane %v1224_v0, 2 }
 0x15a   : > { %v1908_v34 = vperm.slane %v1224_v0, 3  ;;  %v1826_v24 = vadd.f32 %v1794_v41, %v1617_v11  ;;  %v1314_v10 = vperm.slane %v1224_v0, 4  ;;  %v1491_v40 = vperm.slane %v1224_v0, 5 }
 0x15b   : > { %2066 = vst [vmem:[%s3082_s14 + $0x80] sm:$0x1f] %v2034_v55  ;;  %v1377_v29 = vperm.slane %v1313_v59, 0  ;;  %v1554_v44 = vperm.slane %v1490_v5, 1  ;;  %v1763_v3 = vperm.slane %v1699_v35, 2  ;;  %v1700_v15 = vperm.slane %v1224_v0, 6 }
 0x15c   : > { %v1972_v56 = vperm.slane %v1908_v34, 3  ;;  %v2035_v14 = vadd.f32 %v2003_v19, %v1826_v24  ;;  %v1378_v60 = vperm.slane %v1314_v10, 0  ;;  %v1555_v43 = vperm.slane %v1491_v40, 1  ;;  %v1242_v35 = vld [vmem:[%s3020_s7 + $0x58] sm:$0x77] }
 0x15d   : > { %v1409_v47 = vmul.f32 %v1377_v29, %v1265_v8  ;;  %v1586_v62 = vmul.f32 %v1554_v44, %v1458_v12  ;;  %v1795_v46 = vmul.f32 %v1763_v3, %v1667_v48  ;;  %v1877_v6 = vunpack.c.h.bf16 %v3221_v13  ;;  %v2198_v44 = vld [vmem:[%s3020_s7 + $0xd8] sm:$0x77] }
 0x15e   : > { %v2004_v21 = vmul.f32 %v1972_v56, %v1876_v50  ;;  %2067 = vst [vmem:[%s3082_s14 + $0x88] sm:$0x1f] %v2035_v14  ;;  %v1410_v1 = vmul.f32 %v1378_v60, %v1266_v4  ;;  %v1587_v32 = vmul.f32 %v1555_v43, %v1459_v25  ;;  %v1909_v49 = vperm.slane %v1224_v0, 7  ;;  %v3254_v10 = vld [vmem:[%s3020_s7 + $0x158] sm:$0x77] }
 0x15f   : > { %v1618_v37 = vadd.f32 %v1586_v62, %v1409_v47  ;;  %v3408_v42 = vrot.slane %v3008_v57, 4  ;;  %v1267_v52 = vunpack.c.l.bf16 %v1241_v23  ;;  %v1764_v38 = vperm.slane %v1700_v15, 2  ;;  %v3259_v14 = vld [vmem:[%s3020_s7 + $0x1d8] sm:$0x77] }
 0x160   : > { %v1460_v54 = vunpack.c.l.bf16 %v2197_v18  ;;  %v1619_v45 = vadd.f32 %v1587_v32, %v1410_v1  ;;  %v1973_v58 = vperm.slane %v1909_v49, 3  ;;  %v1669_v13 = vunpack.c.l.bf16 %v3235_v2 }
 0x161   : > { %v1193_v7 = vsel %vm427_vm0, %v3004_v27, %v3408_v42  ;;  %v1827_v20 = vadd.f32 %v1795_v46, %v1618_v37  ;;  %v1878_v36 = vunpack.c.l.bf16 %v3240_v28  ;;  %v1796_v26 = vmul.f32 %v1764_v38, %v1668_v22 }
 0x162   : > { %v1225_v31 = vmul.f32 %v2853_v17, %v1193_v7  ;;  %v2005_v8 = vmul.f32 %v1973_v58, %v1877_v6  ;;  %v1268_v53 = vunpack.c.h.bf16 %v1241_v23  ;;  %v1461_v50 = vunpack.c.h.bf16 %v2197_v18 }
 0x163   : > { %v2036_v16 = vadd.f32 %v2004_v21, %v1827_v20  ;;  %v1828_v0 = vadd.f32 %v1796_v26, %v1619_v45  ;;  %v1670_v29 = vunpack.c.h.bf16 %v3235_v2  ;;  %v1879_v40 = vunpack.c.h.bf16 %v3240_v28 }
 0x164   : > { %v1315_v63 = vperm.slane %v1225_v31, 0  ;;  %v1492_v57 = vperm.slane %v1225_v31, 1  ;;  %v1701_v30 = vperm.slane %v1225_v31, 2  ;;  %v1910_v27 = vperm.slane %v1225_v31, 3 }
 0x165   : > { %2068 = vst [vmem:[%s3082_s14 + $0x90] sm:$0x1f] %v2036_v16  ;;  %v1316_v11 = vperm.slane %v1225_v31, 4  ;;  %v1493_v55 = vperm.slane %v1225_v31, 5  ;;  %v2037_v41 = vadd.f32 %v2005_v8, %v1828_v0  ;;  %v1702_v25 = vperm.slane %v1225_v31, 6 }
 0x166   : > { %v1379_v12 = vperm.slane %v1315_v63, 0  ;;  %v1556_v17 = vperm.slane %v1492_v57, 1  ;;  %v1765_v33 = vperm.slane %v1701_v30, 2  ;;  %v1974_v48 = vperm.slane %v1910_v27, 3  ;;  %v1243_v63 = vld [vmem:[%s3020_s7 + $0x60] sm:$0x77] }
 0x167   : > { %v1380_v19 = vperm.slane %v1316_v11, 0  ;;  %v1557_v24 = vperm.slane %v1493_v55, 1  ;;  %2069 = vst [vmem:[%s3082_s14 + $0x98] sm:$0x1f] %v2037_v41  ;;  %v1911_v62 = vperm.slane %v1225_v31, 7  ;;  %v3409_v60 = vrot.slane %v3014_v39, 4 }
 0x168   : > { %v1411_v59 = vmul.f32 %v1379_v12, %v1267_v52  ;;  %v1588_v5 = vmul.f32 %v1556_v17, %v1460_v54  ;;  %v1797_v34 = vmul.f32 %v1765_v33, %v1669_v13  ;;  %v2006_v4 = vmul.f32 %v1974_v48, %v1878_v36  ;;  %v3273_v0 = vld [vmem:[%s3020_s7 + $0x160] sm:$0x77] }
 0x169   : > { %v1412_v56 = vmul.f32 %v1380_v19, %v1268_v53  ;;  %v1589_v47 = vmul.f32 %v1557_v24, %v1461_v50  ;;  %v1194_v23 = vsel %vm427_vm0, %v3012_v9, %v3409_v60  ;;  %v1269_v46 = vunpack.c.l.bf16 %v1242_v35  ;;  %v2199_v53 = vld [vmem:[%s3020_s7 + $0xe0] sm:$0x77] }
 0x16a   : > { %v1620_v3 = vadd.f32 %v1588_v5, %v1411_v59  ;;  %v1766_v43 = vperm.slane %v1702_v25, 2  ;;  %v1226_v22 = vmul.f32 %v2866_v51, %v1194_v23  ;;  %v1462_v18 = vunpack.c.l.bf16 %v2198_v44  ;;  %v3278_v48 = vld [vmem:[%s3020_s7 + $0x1e0] sm:$0x77] }
 0x16b   : > { %v1621_v2 = vadd.f32 %v1589_v47, %v1412_v56  ;;  %v1975_v37 = vperm.slane %v1911_v62, 3  ;;  %v1671_v1 = vunpack.c.l.bf16 %v3254_v10  ;;  %v1880_v15 = vunpack.c.l.bf16 %v3259_v14  ;;  %v3411_v59 = vld [vmem:[#allocation10_spill] sm:$0xff] }
 0x16c   : > { %v1829_v21 = vadd.f32 %v1797_v34, %v1620_v3  ;;  %v1798_v28 = vmul.f32 %v1766_v43, %v1670_v29  ;;  %v1317_v32 = vperm.slane %v1226_v22, 0  ;;  %v1494_v39 = vperm.slane %v1226_v22, 1 }
 0x16d   : > { %v2007_v49 = vmul.f32 %v1975_v37, %v1879_v40  ;;  %v1703_v42 = vperm.slane %v1226_v22, 2  ;;  %v1912_v9 = vperm.slane %v1226_v22, 3  ;;  %v1270_v7 = vunpack.c.h.bf16 %v1242_v35 }
 0x16e   : > { %v2038_v6 = vadd.f32 %v2006_v4, %v1829_v21  ;;  %v1830_v52 = vadd.f32 %v1798_v28, %v1621_v2  ;;  %v1381_v20 = vperm.slane %v1317_v32, 0  ;;  %v1558_v51 = vperm.slane %v1494_v39, 1  ;;  %v3412_v4 = vld [vmem:[#allocation6_spill] sm:$0xff]  ;;  %v1244_v39 = vld [vmem:[%s3020_s7 + $0x68] sm:$0x77] }
 0x16f   : > { %v1318_v38 = vperm.slane %v1226_v22, 4  ;;  %v1767_v31 = vperm.slane %v1703_v42, 2  ;;  %v1976_v54 = vperm.slane %v1912_v9, 3  ;;  %v1463_v45 = vunpack.c.h.bf16 %v2198_v44 }
 0x170   : > { %2070 = vst [vmem:[%s3082_s14 + $0xa0] sm:$0x1f] %v2038_v6  ;;  %v1495_v58 = vperm.slane %v1226_v22, 5  ;;  %v2039_v13 = vadd.f32 %v2007_v49, %v1830_v52  ;;  %v1413_v36 = vmul.f32 %v1381_v20, %v1269_v46  ;;  %v1590_v16 = vmul.f32 %v1558_v51, %v1462_v18  ;;  %v2200_v52 = vld [vmem:[%s3020_s7 + $0xe8] sm:$0x77] }
 0x171   : > { %v1382_v26 = vperm.slane %v1318_v38, 0  ;;  %v1799_v57 = vmul.f32 %v1767_v31, %v1671_v1  ;;  %v2008_v8 = vmul.f32 %v1976_v54, %v1880_v15  ;;  %v1672_v27 = vunpack.c.h.bf16 %v3254_v10  ;;  %v3292_v20 = vld [vmem:[%s3020_s7 + $0x168] sm:$0x77] }
 0x172   : > { %v1559_v30 = vperm.slane %v1495_v58, 1  ;;  %2071 = vst [vmem:[%s3082_s14 + $0xa8] sm:$0x1f] %v2039_v13  ;;  %v1622_v12 = vadd.f32 %v1590_v16, %v1413_v36  ;;  %v1704_v11 = vperm.slane %v1226_v22, 6  ;;  %v1881_v33 = vunpack.c.h.bf16 %v3259_v14  ;;  %v3413_v36 = vld [vmem:[#allocation12_spill] sm:$0xff] }
 0x173   : > { %v1414_v17 = vmul.f32 %v1382_v26, %v1270_v7  ;;  %v1913_v55 = vperm.slane %v1226_v22, 7  ;;  %v3410_v41 = vrot.slane %v3040_v61, 4  ;;  %v1271_v19 = vunpack.c.l.bf16 %v1243_v63  ;;  %v3415_v26 = vld [vmem:[#allocation11_spill] sm:$0xff] }
 0x174   : > { %v1591_v50 = vmul.f32 %v1559_v30, %v1463_v45  ;;  %v1831_v35 = vadd.f32 %v1799_v57, %v1622_v12  ;;  %v1768_v34 = vperm.slane %v1704_v11, 2  ;;  %v1464_v29 = vunpack.c.l.bf16 %v2199_v53  ;;  %v3297_v45 = vld [vmem:[%s3020_s7 + $0x1e8] sm:$0x77] }
 0x175   : > { %v1195_v5 = vsel %vm427_vm0, %v3411_v59, %v3410_v41  ;;  %v1977_v10 = vperm.slane %v1913_v55, 3  ;;  %v1673_v3 = vunpack.c.l.bf16 %v3273_v0  ;;  %v1882_v56 = vunpack.c.l.bf16 %v3278_v48 }
 0x176   : > { %v1227_v24 = vmul.f32 %v3412_v4, %v1195_v5  ;;  %v1623_v44 = vadd.f32 %v1591_v50, %v1414_v17  ;;  %v2040_v25 = vadd.f32 %v2008_v8, %v1831_v35  ;;  %v1800_v40 = vmul.f32 %v1768_v34, %v1672_v27  ;;  %v3416_v27 = vld [vmem:[#allocation7_spill] sm:$0xff] }
 0x177   : > { %v2009_v47 = vmul.f32 %v1977_v10, %v1881_v33  ;;  %v1272_v23 = vunpack.c.h.bf16 %v1243_v63  ;;  %v1465_v37 = vunpack.c.h.bf16 %v2199_v53  ;;  %v1674_v7 = vunpack.c.h.bf16 %v3273_v0 }
 0x178   : > { %v1319_v14 = vperm.slane %v1227_v24, 0  ;;  %v1496_v61 = vperm.slane %v1227_v24, 1  ;;  %v1705_v62 = vperm.slane %v1227_v24, 2  ;;  %v1914_v60 = vperm.slane %v1227_v24, 3  ;;  %2072 = vst [vmem:[%s3082_s14 + $0xb0] sm:$0x1f] %v2040_v25 }
 0x179   : > { %v1832_v46 = vadd.f32 %v1800_v40, %v1623_v44  ;;  %v1320_v22 = vperm.slane %v1227_v24, 4  ;;  %v1497_v1 = vperm.slane %v1227_v24, 5  ;;  %v1706_v31 = vperm.slane %v1227_v24, 6 }
 0x17a   : > { %v1383_v21 = vperm.slane %v1319_v14, 0  ;;  %v1560_v43 = vperm.slane %v1496_v61, 1  ;;  %v1769_v18 = vperm.slane %v1705_v62, 2  ;;  %v1978_v2 = vperm.slane %v1914_v60, 3 }
 0x17b   : > { %v2041_v15 = vadd.f32 %v2009_v47, %v1832_v46  ;;  %v1384_v32 = vperm.slane %v1320_v22, 0  ;;  %v1561_v9 = vperm.slane %v1497_v1, 1  ;;  %v1883_v54 = vunpack.c.h.bf16 %v3278_v48  ;;  %v1245_v47 = vld [vmem:[%s3020_s7 + $0x70] sm:$0x77] }
 0x17c   : > { %v1415_v6 = vmul.f32 %v1383_v21, %v1271_v19  ;;  %v1592_v28 = vmul.f32 %v1560_v43, %v1464_v29  ;;  %v1801_v49 = vmul.f32 %v1769_v18, %v1673_v3  ;;  %v2010_v42 = vmul.f32 %v1978_v2, %v1882_v56  ;;  %v2201_v21 = vld [vmem:[%s3020_s7 + $0xf0] sm:$0x77] }
 0x17d   : > { %2073 = vst [vmem:[%s3082_s14 + $0xb8] sm:$0x1f] %v2041_v15  ;;  %v1416_v38 = vmul.f32 %v1384_v32, %v1272_v23  ;;  %v1593_v58 = vmul.f32 %v1561_v9, %v1465_v37  ;;  %v1915_v13 = vperm.slane %v1227_v24, 7  ;;  %v3414_v16 = vrot.slane %v3413_v36, 4  ;;  %v3311_v43 = vld [vmem:[%s3020_s7 + $0x170] sm:$0x77] }
 0x17e   : > { %v1624_v51 = vadd.f32 %v1592_v28, %v1415_v6  ;;  %v1273_v57 = vunpack.c.l.bf16 %v1244_v39  ;;  %v1770_v30 = vperm.slane %v1706_v31, 2  ;;  %v1466_v0 = vunpack.c.l.bf16 %v2200_v52  ;;  %v3316_v1 = vld [vmem:[%s3020_s7 + $0x1f0] sm:$0x77]  ;;  %v3417_v28 = vld [vmem:[#allocation14_spill] sm:$0xff] }
 0x17f   : > { %v1196_v63 = vsel %vm427_vm0, %v3415_v26, %v3414_v16  ;;  %v1625_v12 = vadd.f32 %v1593_v58, %v1416_v38  ;;  %v1979_v17 = vperm.slane %v1915_v13, 3  ;;  %v1675_v11 = vunpack.c.l.bf16 %v3292_v20 }
 0x180   : > { %v1833_v8 = vadd.f32 %v1801_v49, %v1624_v51  ;;  %v1228_v53 = vmul.f32 %v3416_v27, %v1196_v63  ;;  %v1884_v33 = vunpack.c.l.bf16 %v3297_v45  ;;  %v1802_v50 = vmul.f32 %v1770_v30, %v1674_v7 }
 0x181   : > { %v2011_v59 = vmul.f32 %v1979_v17, %v1883_v54  ;;  %v1274_v35 = vunpack.c.h.bf16 %v1244_v39  ;;  %v1467_v3 = vunpack.c.h.bf16 %v2200_v52  ;;  %v1676_v46 = vunpack.c.h.bf16 %v3292_v20  ;;  %v3419_v39 = vld [vmem:[#allocation13_spill] sm:$0xff]  ;;  %v3420_v52 = vld [vmem:[#allocation8_spill] sm:$0xff] }
 0x182   : > { %v2042_v48 = vadd.f32 %v2010_v42, %v1833_v8  ;;  %v1321_v55 = vperm.slane %v1228_v53, 0  ;;  %v1498_v41 = vperm.slane %v1228_v53, 1  ;;  %v1707_v5 = vperm.slane %v1228_v53, 2 }
 0x183   : > { %v1916_v19 = vperm.slane %v1228_v53, 3  ;;  %v1834_v34 = vadd.f32 %v1802_v50, %v1625_v12  ;;  %v1322_v29 = vperm.slane %v1228_v53, 4  ;;  %v1499_v56 = vperm.slane %v1228_v53, 5 }
 0x184   : > { %2074 = vst [vmem:[%s3082_s14 + $0xc0] sm:$0x1f] %v2042_v48  ;;  %v1385_v4 = vperm.slane %v1321_v55, 0  ;;  %v1562_v24 = vperm.slane %v1498_v41, 1  ;;  %v1771_v44 = vperm.slane %v1707_v5, 2  ;;  %v1708_v2 = vperm.slane %v1228_v53, 6 }
 0x185   : > { %v1980_v10 = vperm.slane %v1916_v19, 3  ;;  %v2043_v25 = vadd.f32 %v2011_v59, %v1834_v34  ;;  %v1386_v61 = vperm.slane %v1322_v29, 0  ;;  %v1563_v23 = vperm.slane %v1499_v56, 1  ;;  %v1246_v59 = vld [vmem:[%s3020_s7 + $0x78] sm:$0x77] }
 0x186   : > { %v1417_v40 = vmul.f32 %v1385_v4, %v1273_v57  ;;  %v1594_v14 = vmul.f32 %v1562_v24, %v1466_v0  ;;  %v1803_v62 = vmul.f32 %v1771_v44, %v1675_v11  ;;  %v1885_v37 = vunpack.c.h.bf16 %v3297_v45  ;;  %v2202_v4 = vld [vmem:[%s3020_s7 + $0xf8] sm:$0x77] }
 0x187   : > { %v2012_v60 = vmul.f32 %v1980_v10, %v1884_v33  ;;  %2075 = vst [vmem:[%s3082_s14 + $0xc8] sm:$0x1f] %v2043_v25  ;;  %v1418_v18 = vmul.f32 %v1386_v61, %v1274_v35  ;;  %v1595_v15 = vmul.f32 %v1563_v23, %v1467_v3  ;;  %v1917_v6 = vperm.slane %v1228_v53, 7  ;;  %v2218_v24 = vld [vmem:[%s3020_s7 + $0x178] sm:$0x77] }
 0x188   : > { %v1626_v22 = vadd.f32 %v1594_v14, %v1417_v40  ;;  %v3418_v32 = vrot.slane %v3417_v28, 4  ;;  %v1275_v42 = vunpack.c.l.bf16 %v1245_v47  ;;  %v1772_v7 = vperm.slane %v1708_v2, 2  ;;  %v2234_v56 = vld [vmem:[%s3020_s7 + $0x1f8] sm:$0x77]  ;;  %v3421_v14 = vld [vmem:[#allocation16_spill] sm:$0xff] }
 0x189   : > { %v1468_v51 = vunpack.c.l.bf16 %v2201_v21  ;;  %v1627_v38 = vadd.f32 %v1595_v15, %v1418_v18  ;;  %v1981_v31 = vperm.slane %v1917_v6, 3  ;;  %v1677_v54 = vunpack.c.l.bf16 %v3311_v43 }
 0x18a   : > { %v1197_v49 = vsel %vm427_vm0, %v3419_v39, %v3418_v32  ;;  %v1835_v9 = vadd.f32 %v1803_v62, %v1626_v22  ;;  %v1886_v45 = vunpack.c.l.bf16 %v3316_v1  ;;  %v1804_v13 = vmul.f32 %v1772_v7, %v1676_v46 }
 0x18b   : > { %v1229_v20 = vmul.f32 %v3420_v52, %v1197_v49  ;;  %v2013_v26 = vmul.f32 %v1981_v31, %v1885_v37  ;;  %v1276_v8 = vunpack.c.h.bf16 %v1245_v47  ;;  %v1469_v11 = vunpack.c.h.bf16 %v2201_v21  ;;  %v3423_v47 = vld [vmem:[#allocation15_spill] sm:$0xff]  ;;  %v3424_v21 = vld [vmem:[#allocation9_spill] sm:$0xff] }
 0x18c   : > { %v2044_v58 = vadd.f32 %v2012_v60, %v1835_v9  ;;  %v1836_v30 = vadd.f32 %v1804_v13, %v1627_v38  ;;  %v1678_v34 = vunpack.c.h.bf16 %v3311_v43  ;;  %v1887_v3 = vunpack.c.h.bf16 %v3316_v1 }
 0x18d   : > { %v1323_v36 = vperm.slane %v1229_v20, 0  ;;  %v1500_v16 = vperm.slane %v1229_v20, 1  ;;  %v1709_v63 = vperm.slane %v1229_v20, 2  ;;  %v1918_v57 = vperm.slane %v1229_v20, 3 }
 0x18e   : > { %2076 = vst [vmem:[%s3082_s14 + $0xd0] sm:$0x1f] %v2044_v58  ;;  %v1324_v0 = vperm.slane %v1229_v20, 4  ;;  %v1501_v33 = vperm.slane %v1229_v20, 5  ;;  %v2045_v48 = vadd.f32 %v2013_v26, %v1836_v30  ;;  %v1710_v10 = vperm.slane %v1229_v20, 6 }
 0x18f   : > { %v1387_v27 = vperm.slane %v1323_v36, 0  ;;  %v1564_v53 = vperm.slane %v1500_v16, 1  ;;  %v1773_v12 = vperm.slane %v1709_v63, 2  ;;  %v1982_v17 = vperm.slane %v1918_v57, 3 }
 0x190   : > { %v1388_v41 = vperm.slane %v1324_v0, 0  ;;  %v1565_v35 = vperm.slane %v1501_v33, 1  ;;  %2077 = vst [vmem:[%s3082_s14 + $0xd8] sm:$0x1f] %v2045_v48  ;;  %v1919_v40 = vperm.slane %v1229_v20, 7  ;;  %v3422_v61 = vrot.slane %v3421_v14, 4 }
 0x191   : > { %v1419_v50 = vmul.f32 %v1387_v27, %v1275_v42  ;;  %v1596_v55 = vmul.f32 %v1564_v53, %v1468_v51  ;;  %v1805_v5 = vmul.f32 %v1773_v12, %v1677_v54  ;;  %v2014_v19 = vmul.f32 %v1982_v17, %v1886_v45 }
 0x192   : > { %v1420_v44 = vmul.f32 %v1388_v41, %v1276_v8  ;;  %v1597_v25 = vmul.f32 %v1565_v35, %v1469_v11  ;;  %v1198_v62 = vsel %vm427_vm0, %v3423_v47, %v3422_v61  ;;  %v1277_v60 = vunpack.c.l.bf16 %v1246_v59 }
 0x193   : > { %v1628_v29 = vadd.f32 %v1596_v55, %v1419_v50  ;;  %v1774_v46 = vperm.slane %v1710_v10, 2  ;;  %v1230_v43 = vmul.f32 %v3424_v21, %v1198_v62  ;;  %v1470_v22 = vunpack.c.l.bf16 %v2202_v4 }
 0x194   : > { %v1629_v18 = vadd.f32 %v1597_v25, %v1420_v44  ;;  %v1983_v2 = vperm.slane %v1919_v40, 3  ;;  %v1679_v37 = vunpack.c.l.bf16 %v2218_v24  ;;  %v1888_v15 = vunpack.c.l.bf16 %v2234_v56 }
 0x195   : > { %v1837_v23 = vadd.f32 %v1805_v5, %v1628_v29  ;;  %v1806_v6 = vmul.f32 %v1774_v46, %v1678_v34  ;;  %v1325_v28 = vperm.slane %v1230_v43, 0  ;;  %v1502_v32 = vperm.slane %v1230_v43, 1 }
 0x196   : > { %v2015_v39 = vmul.f32 %v1983_v2, %v1887_v3  ;;  %v1711_v49 = vperm.slane %v1230_v43, 2  ;;  %v1920_v42 = vperm.slane %v1230_v43, 3  ;;  %v1278_v9 = vunpack.c.h.bf16 %v1246_v59 }
 0x197   : > { %v2046_v1 = vadd.f32 %v2014_v19, %v1837_v23  ;;  %v1838_v7 = vadd.f32 %v1806_v6, %v1629_v18  ;;  %v1389_v52 = vperm.slane %v1325_v28, 0  ;;  %v1566_v20 = vperm.slane %v1502_v32, 1 }
 0x198   : > { %v1326_v51 = vperm.slane %v1230_v43, 4  ;;  %v1775_v38 = vperm.slane %v1711_v49, 2  ;;  %v1984_v31 = vperm.slane %v1920_v42, 3  ;;  %v1471_v54 = vunpack.c.h.bf16 %v2202_v4 }
 0x199   : > { %2078 = vst [vmem:[%s3082_s14 + $0xe0] sm:$0x1f] %v2046_v1  ;;  %v1503_v45 = vperm.slane %v1230_v43, 5  ;;  %v2047_v58 = vadd.f32 %v2015_v39, %v1838_v7  ;;  %v1421_v13 = vmul.f32 %v1389_v52, %v1277_v60  ;;  %v1598_v36 = vmul.f32 %v1566_v20, %v1470_v22 }
 0x19a   : > { %v1390_v16 = vperm.slane %v1326_v51, 0  ;;  %v1807_v26 = vmul.f32 %v1775_v38, %v1679_v37  ;;  %v1680_v30 = vunpack.c.h.bf16 %v2218_v24  ;;  %v1712_v27 = vperm.slane %v1230_v43, 6 }
 0x19b   : > { %v1567_v63 = vperm.slane %v1503_v45, 1  ;;  %2079 = vst [vmem:[%s3082_s14 + $0xe8] sm:$0x1f] %v2047_v58  ;;  %v1630_v57 = vadd.f32 %v1598_v36, %v1421_v13  ;;  %v1921_v0 = vperm.slane %v1230_v43, 7  ;;  %v2016_v17 = vmul.f32 %v1984_v31, %v1888_v15 }
 0x19c   : > { %v1422_v8 = vmul.f32 %v1390_v16, %v1278_v9  ;;  %v1776_v11 = vperm.slane %v1712_v27, 2  ;;  %v1889_v33 = vunpack.c.h.bf16 %v2234_v56 }
 0x19d   : > { %v1599_v53 = vmul.f32 %v1567_v63, %v1471_v54  ;;  %v1839_v12 = vadd.f32 %v1807_v26, %v1630_v57  ;;  %v1985_v50 = vperm.slane %v1921_v0, 3 }
 0x19e   : > { %v1808_v41 = vmul.f32 %v1776_v11, %v1680_v30 }
 0x19f   : > { %v1631_v48 = vadd.f32 %v1599_v53, %v1422_v8  ;;  %v2048_v55 = vadd.f32 %v2016_v17, %v1839_v12  ;;  %v2017_v5 = vmul.f32 %v1985_v50, %v1889_v33 }
 0x1a1   : > { %2080 = vst [vmem:[%s3082_s14 + $0xf0] sm:$0x1f] %v2048_v55  ;;  %v1840_v59 = vadd.f32 %v1808_v41, %v1631_v48 }
 0x1a3   : > { %v2049_v19 = vadd.f32 %v2017_v5, %v1840_v59 }
 0x1a5   : > { %2081 = vst [vmem:[%s3082_s14 + $0xf8] sm:$0x1f] %v2049_v19 }
 0x1a6   : > { %2404 = shalt.err (!%p2401_p7)
}
 0x1a7   : > { %2242 = dma.vmem_to_hbm [thread:$0]  (%p2495_p6), %s2097_s13, 4096, %s2099_s23, %s2083_s24  }
 0x1a8 PF: > { %p2248_p9 = scmp.ge.s32.totalorder %s2439_s12, 2  ;;  %s2110_s4 = sand.u32 1, %s2427_s9  }
 0x1a9   : > { %s2111_s5 = scalar_lea.sflag [#allocation4], %s2110_s4 }
 0x1aa   : > { %p2245_p10 = pnand %p2248_p9, %p2499_p8 }
 0x1ac   : > { %p2246_p11 = pneg %p2245_p10 }
 0x1ae   : > { %2422 = dma.done.wait (%p2246_p11), %s2111_s5, 4096  }
 0x1af   : > { %2424 = vsyncadd (%p2246_p11), %s2111_s5, 4294963200  ;;  %p12_p12 = scmp.ge.s32.totalorder %s2481_s15, 6   ;;  %s3425_s9 = smov %s2431_s10 }
 0x1b0   : > { %s3426_s10 = smov %s2435_s11  ;;  %s3427_s11 = smov %s2493_s18 }
 0x1b1   : > { %s3428_s12 = smov %s2481_s15  ;;  %14 = sbr.rel (!%p12_p12) target bundleno = 3 (0x3), region = 103 }
 0x1b6   :  { %2117 = vsyncpa [#allocation4], 1 }
 0x1b7   :  { %2119 = vsyncpa [#allocation4 + $0x1], 1 }

</bundles_post_ra>
